<compile_context>
chip_gen: v6e
topology: v6e:2x2x1
jax: 0.10.0
libtpu: 0.0.40
codegen_flags: <defaults>
</compile_context>

<pallas_src>
import functools

import jax
import jax.numpy as jnp
from jax.experimental import pallas as pl
from jax.experimental.pallas import tpu as pltpu


def _layer_norm_f32(v, gamma, beta, eps=1e-5):
    # torch.nn.LayerNorm over the last dim, computed in float32.
    # Single fused pass: E[x] and E[x^2] together (one fewer XLU reduction).
    mu = jnp.mean(v, axis=-1, keepdims=True)
    ms = jnp.mean(v * v, axis=-1, keepdims=True)
    var = jnp.maximum(ms - mu * mu, 0.0)
    return (v - mu) * jax.lax.rsqrt(var + eps) * gamma + beta


def rab_kernel(x_ref,
               ln1_g_ref, ln1_b_ref,
               w_in_ref, b_in_ref,          # qkv in-proj: (D, 3D) bf16, (1, 3D) f32
               w_out_ref, b_out_ref,        # attn out-proj: (D, D) bf16, (1, D) f32
               ln2_g_ref, ln2_b_ref,
               w_fc_ref, b_fc_ref,          # mlp c_fc: (D, 4D) bf16, (1, 4D) f32
               w_proj_ref, b_proj_ref,      # mlp c_proj: (4D, D) bf16, (1, D) f32
               o_ref,
               *, n_head):
    xb = x_ref[...].astype(jnp.float32)      # (TB, S, D) -- TB batch elements per grid step
    TB, S, D = xb.shape
    Dh = D // n_head
    scale = 1.0 / (Dh ** 0.5)

    x2 = xb.reshape(TB * S, D)               # flatten rows for all projections / MLP

    # ---- ln_1 (float32, like the LayerNorm subclass) ----
    h = _layer_norm_f32(x2, ln1_g_ref[0], ln1_b_ref[0])

    # ---- fused QKV in-projection: bf16 operands, f32 accumulation, single bias add ----
    qkv = jnp.dot(h.astype(jnp.bfloat16), w_in_ref[...],
                  preferred_element_type=jnp.float32) + b_in_ref[0]       # (TB*S, 3D) f32

    # D-wide (128-aligned when D % 128 == 0) Q/K/V slices; fold softmax scale into Q once.
    qf = qkv[:, :D] * scale
    kf = qkv[:, D:2 * D]
    vf = qkv[:, 2 * D:]

    # ---- multi-head self-attention (q = k = v = ln_1(x)) ----
    # Per-head batched einsums on the MXU; the out-projection is accumulated per head so
    # no (TB*S, D) context concat is ever materialized and each ctx_h dies immediately.
    attn_acc = jnp.zeros((TB * S, D), jnp.float32)
    for hd in range(n_head):
        sl = slice(hd * Dh, (hd + 1) * Dh)
        qh = qf[:, sl].reshape(TB, S, Dh).astype(jnp.bfloat16)
        kh = kf[:, sl].reshape(TB, S, Dh).astype(jnp.bfloat16)
        vh = vf[:, sl].reshape(TB, S, Dh).astype(jnp.bfloat16)

        s = jnp.einsum('bqd,bkd->bqk', qh, kh,
                       preferred_element_type=jnp.float32)                # (TB, S, S) f32
        s = s - jnp.max(s, axis=-1, keepdims=True)
        p = jnp.exp(s)
        # EUP approximate reciprocal instead of a per-element VALU divide.
        p = p * pl.reciprocal(jnp.sum(p, axis=-1, keepdims=True), approx=True)
        # NOTE: attention dropout (p=0.2) applies only in training; eval semantics here.
        ctx = jnp.einsum('bqk,bkd->bqd', p.astype(jnp.bfloat16), vh,
                         preferred_element_type=jnp.float32)              # (TB, S, Dh) f32
        # Per-head slice of the out-projection (rows of w_out_t) -> accumulate.
        attn_acc = attn_acc + jnp.dot(
            ctx.reshape(TB * S, Dh).astype(jnp.bfloat16), w_out_ref[sl, :],
            preferred_element_type=jnp.float32)

    x2 = x2 + attn_acc + b_out_ref[0]         # residual 1 (f32)

    # ---- ln_2 + MLP (c_fc -> QuickGELU -> c_proj), hidden dim chunked in 4 x D cols ----
    h2 = _layer_norm_f32(x2, ln2_g_ref[0], ln2_b_ref[0])
    h2_bf = h2.astype(jnp.bfloat16)
    b_fc_row = b_fc_ref[0]                    # (4D,)
    mlp_acc = jnp.zeros((TB * S, D), jnp.float32)
    for c in range(4):
        cols = slice(c * D, (c + 1) * D)
        fc = jnp.dot(h2_bf, w_fc_ref[:, cols],
                     preferred_element_type=jnp.float32) + b_fc_row[cols]  # (TB*S, D) f32
        fc = fc * jax.nn.sigmoid(1.702 * fc)  # QuickGELU in f32
        mlp_acc = mlp_acc + jnp.dot(fc.astype(jnp.bfloat16), w_proj_ref[cols, :],
                                    preferred_element_type=jnp.float32)
    x2 = x2 + mlp_acc + b_proj_ref[0]         # residual 2 (f32)

    o_ref[...] = x2.reshape(TB, S, D).astype(o_ref.dtype)


def _tpu_vmem_capacity_bytes():
    try:
        return int(pltpu.get_tpu_info().vmem_capacity_bytes)
    except Exception:
        return 128 * 1024 * 1024              # conservative default (v5e/v6e)


def _pick_tb(B, S, target_rows):
    """Largest divisor of B with TB*S <= target_rows; guarantees >=2 grid steps if B > 1
    so the 'parallel' batch axis can shard across TensorCores and pipeline x/o DMAs."""
    max_tb = B if B == 1 else B // 2
    tb = 1
    for cand in range(1, max_tb + 1):
        if B % cand == 0 and cand * S <= target_rows:
            tb = cand
    return tb


def residual_attention_block(x, params, n_head):
    """x: (B, S, D) float32. params: dict of pre-transposed bf16 weights / f32 biases."""
    B, S, D = x.shape

    vmem_cap = _tpu_vmem_capacity_bytes()
    # v7x (64 MiB physical): 48 MiB scoped limit, smaller row tiles.
    # v5e/v6e (128 MiB physical): 96 MiB, larger row tiles to amortize per-step overhead.
    vmem_limit = int(min(96 * 1024 * 1024, (vmem_cap * 3) // 4))
    target_rows = 256 if vmem_cap <= 64 * 1024 * 1024 else 512
    TB = _pick_tb(B, S, target_rows)

    def full2d(arr):
        # Constant index map -> block is not re-fetched across grid steps.
        return pl.BlockSpec(arr.shape, lambda b: (0, 0))

    in_specs = [
        pl.BlockSpec((TB, S, D), lambda b: (b, 0, 0)),   # x
        full2d(params["ln1_g"]), full2d(params["ln1_b"]),
        full2d(params["w_in_t"]), full2d(params["b_in"]),
        full2d(params["w_out_t"]), full2d(params["b_out"]),
        full2d(params["ln2_g"]), full2d(params["ln2_b"]),
        full2d(params["w_fc_t"]), full2d(params["b_fc"]),
        full2d(params["w_proj_t"]), full2d(params["b_proj"]),
    ]

    return pl.pallas_call(
        functools.partial(rab_kernel, n_head=n_head),
        out_shape=jax.ShapeDtypeStruct((B, S, D), x.dtype),
        grid_spec=pltpu.PrefetchScalarGridSpec(
            num_scalar_prefetch=0,
            grid=(B // TB,),
            in_specs=in_specs,
            out_specs=pl.BlockSpec((TB, S, D), lambda b: (b, 0, 0)),
        ),
        compiler_params=pltpu.CompilerParams(
            dimension_semantics=("parallel",),   # batch axis shards across TCs on v7x
            vmem_limit_bytes=vmem_limit,
        ),
    )(x,
      params["ln1_g"], params["ln1_b"],
      params["w_in_t"], params["b_in"],
      params["w_out_t"], params["b_out"],
      params["ln2_g"], params["ln2_b"],
      params["w_fc_t"], params["b_fc"],
      params["w_proj_t"], params["b_proj"])


def reference(x, params, n_head):
    """Pure-JAX f32 reference matching the PyTorch module (eval mode)."""
    B, S, D = x.shape
    Dh = D // n_head
    f32 = lambda a: a.astype(jnp.float32)

    def ln(v, g, b):
        mu = v.mean(-1, keepdims=True)
        var = ((v - mu) ** 2).mean(-1, keepdims=True)
        return (v - mu) / jnp.sqrt(var + 1e-5) * g + b

    h = ln(x, params["ln1_g"][0], params["ln1_b"][0])
    qkv = h @ f32(params["w_in_t"]) + params["b_in"][0]
    q, k, v = qkv[..., :D], qkv[..., D:2 * D], qkv[..., 2 * D:]
    q = q.reshape(B, S, n_head, Dh).transpose(0, 2, 1, 3)
    k = k.reshape(B, S, n_head, Dh).transpose(0, 2, 1, 3)
    v = v.reshape(B, S, n_head, Dh).transpose(0, 2, 1, 3)
    s = jnp.einsum("bhqd,bhkd->bhqk", q, k) / (Dh ** 0.5)
    p = jax.nn.softmax(s, axis=-1)
    ctx = jnp.einsum("bhqk,bhkd->bhqd", p, v).transpose(0, 2, 1, 3).reshape(B, S, D)
    attn_out = ctx @ f32(params["w_out_t"]) + params["b_out"][0]
    x = x + attn_out

    h2 = ln(x, params["ln2_g"][0], params["ln2_b"][0])
    fc = h2 @ f32(params["w_fc_t"]) + params["b_fc"][0]
    fc = fc * jax.nn.sigmoid(1.702 * fc)
    x = x + fc @ f32(params["w_proj_t"]) + params["b_proj"][0]
    return x


def make_params(key, d_model):
    ks = jax.random.split(key, 12)
    D = d_model
    n = lambda k, shape, s=0.02: (jax.random.normal(k, shape, jnp.float32) * s)
    bf = lambda a: a.astype(jnp.bfloat16)
    params = {
        "ln1_g": jnp.ones((1, D), jnp.float32) + n(ks[0], (1, D), 0.01),
        "ln1_b": n(ks[1], (1, D), 0.01),
        # stored as (in, out) = already-transposed PyTorch Linear weights, bf16-resident
        "w_in_t": bf(n(ks[2], (D, 3 * D))),
        "b_in": n(ks[3], (1, 3 * D), 0.01),
        "w_out_t": bf(n(ks[4], (D, D))),
        "b_out": n(ks[5], (1, D), 0.01),
        "ln2_g": jnp.ones((1, D), jnp.float32) + n(ks[6], (1, D), 0.01),
        "ln2_b": n(ks[7], (1, D), 0.01),
        "w_fc_t": bf(n(ks[8], (D, 4 * D))),
        "b_fc": n(ks[9], (1, 4 * D), 0.01),
        "w_proj_t": bf(n(ks[10], (4 * D, D))),
        "b_proj": n(ks[11], (1, D), 0.01),
    }
    return params


if __name__ == "__main__":
    # Small but lane-dense config: D is a multiple of 128 so the output store is unmasked
    # and the Q/K/V/out-proj slices are tile-friendly; B=4 gives a 2-step grid.
    B, S, D, H = 4, 16, 128, 4
    key = jax.random.PRNGKey(0)
    kx, kp = jax.random.split(key)
    x = jax.random.normal(kx, (B, S, D), jnp.float32)
    params = make_params(kp, D)

    out = residual_attention_block(x, params, n_head=H)
    out = jax.block_until_ready(out)

    ref = reference(x, params, n_head=H)
    assert out.shape == (B, S, D)
    # bf16 MXU operands + approx reciprocal vs. f32 reference -> slightly loosened tolerance
    assert jnp.allclose(out, ref, rtol=2e-2, atol=2e-2), "mismatch vs reference"

    print("KERNEL_OK")
</pallas_src>

<mosaic_0001>
module attributes {stable_mosaic.version = 11 : i64} {
  func.func @rab_kernel(%arg0: i32, %arg1: memref<2x16x128xf32, #tpu.memory_space<vmem>>, %arg2: memref<1x128xf32, #tpu.memory_space<vmem>>, %arg3: memref<1x128xf32, #tpu.memory_space<vmem>>, %arg4: memref<128x384xbf16, #tpu.memory_space<vmem>>, %arg5: memref<1x384xf32, #tpu.memory_space<vmem>>, %arg6: memref<128x128xbf16, #tpu.memory_space<vmem>>, %arg7: memref<1x128xf32, #tpu.memory_space<vmem>>, %arg8: memref<1x128xf32, #tpu.memory_space<vmem>>, %arg9: memref<1x128xf32, #tpu.memory_space<vmem>>, %arg10: memref<128x512xbf16, #tpu.memory_space<vmem>>, %arg11: memref<1x512xf32, #tpu.memory_space<vmem>>, %arg12: memref<512x128xbf16, #tpu.memory_space<vmem>>, %arg13: memref<1x128xf32, #tpu.memory_space<vmem>>, %arg14: memref<2x16x128xf32, #tpu.memory_space<vmem>>) attributes {dimension_semantics = [#tpu.dimension_semantics<parallel>], iteration_bounds = array<i64: 2>, scalar_prefetch = 0 : i64, scratch_operands = 0 : i64, tpu.core_type = #tpu.core_type<tc>, window_params = [{transform_indices = @transform_0, window_bounds = array<i64: 2, 16, 128>}, {pipeline_mode = #tpu.pipeline_mode<synchronous>, transform_indices = @transform_1, window_bounds = array<i64: 1, 128>}, {pipeline_mode = #tpu.pipeline_mode<synchronous>, transform_indices = @transform_2, window_bounds = array<i64: 1, 128>}, {pipeline_mode = #tpu.pipeline_mode<synchronous>, transform_indices = @transform_3, window_bounds = array<i64: 128, 384>}, {pipeline_mode = #tpu.pipeline_mode<synchronous>, transform_indices = @transform_4, window_bounds = array<i64: 1, 384>}, {pipeline_mode = #tpu.pipeline_mode<synchronous>, transform_indices = @transform_5, window_bounds = array<i64: 128, 128>}, {pipeline_mode = #tpu.pipeline_mode<synchronous>, transform_indices = @transform_6, window_bounds = array<i64: 1, 128>}, {pipeline_mode = #tpu.pipeline_mode<synchronous>, transform_indices = @transform_7, window_bounds = array<i64: 1, 128>}, {pipeline_mode = #tpu.pipeline_mode<synchronous>, transform_indices = @transform_8, window_bounds = array<i64: 1, 128>}, {pipeline_mode = #tpu.pipeline_mode<synchronous>, transform_indices = @transform_9, window_bounds = array<i64: 128, 512>}, {pipeline_mode = #tpu.pipeline_mode<synchronous>, transform_indices = @transform_10, window_bounds = array<i64: 1, 512>}, {pipeline_mode = #tpu.pipeline_mode<synchronous>, transform_indices = @transform_11, window_bounds = array<i64: 512, 128>}, {pipeline_mode = #tpu.pipeline_mode<synchronous>, transform_indices = @transform_12, window_bounds = array<i64: 1, 128>}, {transform_indices = @transform_13, window_bounds = array<i64: 2, 16, 128>}]} {
    %c0 = arith.constant 0 : index
    %c0_0 = arith.constant 0 : index
    %c0_1 = arith.constant 0 : index
    %0 = vector.load %arg1[%c0, %c0_0, %c0_1] : memref<2x16x128xf32, #tpu.memory_space<vmem>>, vector<2x16x128xf32>
    %1 = vector.shape_cast %0 : vector<2x16x128xf32> to vector<32x128xf32>
    %c0_2 = arith.constant 0 : index
    %c0_3 = arith.constant 0 : index
    %2 = vector.load %arg2[%c0_2, %c0_3] : memref<1x128xf32, #tpu.memory_space<vmem>>, vector<1x128xf32>
    %3 = vector.shape_cast %2 : vector<1x128xf32> to vector<128xf32>
    %c0_4 = arith.constant 0 : index
    %c0_5 = arith.constant 0 : index
    %4 = vector.load %arg3[%c0_4, %c0_5] : memref<1x128xf32, #tpu.memory_space<vmem>>, vector<1x128xf32>
    %5 = vector.shape_cast %4 : vector<1x128xf32> to vector<128xf32>
    %cst = arith.constant dense<0.000000e+00> : vector<32xf32>
    %6 = vector.multi_reduction <add>, %1, %cst [1] : vector<32x128xf32> to vector<32xf32>
    %7 = vector.shape_cast %6 : vector<32xf32> to vector<32x1xf32>
    %cst_6 = arith.constant 1.280000e+02 : f32
    %8 = vector.broadcast %cst_6 : f32 to vector<32x1xf32>
    %9 = arith.divf %7, %8 : vector<32x1xf32>
    %10 = arith.mulf %1, %1 : vector<32x128xf32>
    %cst_7 = arith.constant dense<0.000000e+00> : vector<32xf32>
    %11 = vector.multi_reduction <add>, %10, %cst_7 [1] : vector<32x128xf32> to vector<32xf32>
    %12 = vector.shape_cast %11 : vector<32xf32> to vector<32x1xf32>
    %cst_8 = arith.constant 1.280000e+02 : f32
    %13 = vector.broadcast %cst_8 : f32 to vector<32x1xf32>
    %14 = arith.divf %12, %13 : vector<32x1xf32>
    %15 = arith.mulf %9, %9 : vector<32x1xf32>
    %16 = arith.subf %14, %15 : vector<32x1xf32>
    %cst_9 = arith.constant 0.000000e+00 : f32
    %17 = vector.broadcast %cst_9 : f32 to vector<32x1xf32>
    %18 = arith.maximumf %16, %17 : vector<32x1xf32>
    %19 = vector.broadcast %9 : vector<32x1xf32> to vector<32x128xf32>
    %20 = arith.subf %1, %19 : vector<32x128xf32>
    %cst_10 = arith.constant 9.99999974E-6 : f32
    %21 = vector.broadcast %cst_10 : f32 to vector<32x1xf32>
    %22 = arith.addf %18, %21 : vector<32x1xf32>
    %23 = math.rsqrt %22 : vector<32x1xf32>
    %24 = vector.broadcast %23 : vector<32x1xf32> to vector<32x128xf32>
    %25 = arith.mulf %20, %24 : vector<32x128xf32>
    %26 = vector.shape_cast %3 : vector<128xf32> to vector<1x128xf32>
    %27 = vector.broadcast %26 : vector<1x128xf32> to vector<32x128xf32>
    %28 = arith.mulf %25, %27 : vector<32x128xf32>
    %29 = vector.shape_cast %5 : vector<128xf32> to vector<1x128xf32>
    %30 = vector.broadcast %29 : vector<1x128xf32> to vector<32x128xf32>
    %31 = arith.addf %28, %30 : vector<32x128xf32>
    %32 = arith.truncf %31 : vector<32x128xf32> to vector<32x128xbf16>
    %c0_11 = arith.constant 0 : index
    %c0_12 = arith.constant 0 : index
    %33 = vector.load %arg4[%c0_11, %c0_12] : memref<128x384xbf16, #tpu.memory_space<vmem>>, vector<128x384xbf16>
    %cst_13 = arith.constant dense<0.000000e+00> : vector<32x384xf32>
    %34 = tpu.matmul %32, %33, %cst_13 {dimension_numbers = #tpu.dot_dimension_numbers<[1], [0], [0], [1], [0, 0, 1, 1], [], []>} : vector<32x128xbf16>, vector<128x384xbf16>, vector<32x384xf32> -> vector<32x384xf32>
    %c0_14 = arith.constant 0 : index
    %c0_15 = arith.constant 0 : index
    %35 = vector.load %arg5[%c0_14, %c0_15] : memref<1x384xf32, #tpu.memory_space<vmem>>, vector<1x384xf32>
    %36 = vector.shape_cast %35 : vector<1x384xf32> to vector<384xf32>
    %37 = vector.shape_cast %36 : vector<384xf32> to vector<1x384xf32>
    %38 = vector.broadcast %37 : vector<1x384xf32> to vector<32x384xf32>
    %39 = arith.addf %34, %38 : vector<32x384xf32>
    %40 = vector.extract_strided_slice %39 {offsets = [0, 0], sizes = [32, 128], strides = [1, 1]} : vector<32x384xf32> to vector<32x128xf32>
    %cst_16 = arith.constant 0.176776692 : f32
    %41 = vector.broadcast %cst_16 : f32 to vector<32x128xf32>
    %42 = arith.mulf %40, %41 : vector<32x128xf32>
    %43 = vector.extract_strided_slice %39 {offsets = [0, 128], sizes = [32, 128], strides = [1, 1]} : vector<32x384xf32> to vector<32x128xf32>
    %44 = vector.extract_strided_slice %39 {offsets = [0, 256], sizes = [32, 128], strides = [1, 1]} : vector<32x384xf32> to vector<32x128xf32>
    %cst_17 = arith.constant 0.000000e+00 : f32
    %45 = vector.broadcast %cst_17 : f32 to vector<32x128xf32>
    %46 = vector.extract_strided_slice %42 {offsets = [0, 0], sizes = [32, 32], strides = [1, 1]} : vector<32x128xf32> to vector<32x32xf32>
    %47 = vector.shape_cast %46 : vector<32x32xf32> to vector<2x16x32xf32>
    %48 = arith.truncf %47 : vector<2x16x32xf32> to vector<2x16x32xbf16>
    %49 = vector.extract_strided_slice %43 {offsets = [0, 0], sizes = [32, 32], strides = [1, 1]} : vector<32x128xf32> to vector<32x32xf32>
    %50 = vector.shape_cast %49 : vector<32x32xf32> to vector<2x16x32xf32>
    %51 = arith.truncf %50 : vector<2x16x32xf32> to vector<2x16x32xbf16>
    %52 = vector.extract_strided_slice %44 {offsets = [0, 0], sizes = [32, 32], strides = [1, 1]} : vector<32x128xf32> to vector<32x32xf32>
    %53 = vector.shape_cast %52 : vector<32x32xf32> to vector<2x16x32xf32>
    %54 = arith.truncf %53 : vector<2x16x32xf32> to vector<2x16x32xbf16>
    "tpu.trace_start"() <{level = 10 : i32, message = "bqd,bkd->bqk"}> : () -> ()
    %cst_18 = arith.constant dense<0.000000e+00> : vector<2x16x16xf32>
    %55 = tpu.matmul %48, %51, %cst_18 {dimension_numbers = #tpu.dot_dimension_numbers<[2], [2], [1], [1], [0, 0, 0, 1, 1, 1], [0], [0]>} : vector<2x16x32xbf16>, vector<2x16x32xbf16>, vector<2x16x16xf32> -> vector<2x16x16xf32>
    "tpu.trace_stop"() : () -> ()
    %cst_19 = arith.constant dense<0xFF800000> : vector<2x16xf32>
    %56 = vector.multi_reduction <maximumf>, %55, %cst_19 [2] : vector<2x16x16xf32> to vector<2x16xf32>
    %57 = vector.shape_cast %56 : vector<2x16xf32> to vector<2x16x1xf32>
    %58 = vector.broadcast %57 : vector<2x16x1xf32> to vector<2x16x16xf32>
    %59 = arith.subf %55, %58 : vector<2x16x16xf32>
    %60 = math.exp %59 : vector<2x16x16xf32>
    %cst_20 = arith.constant dense<0.000000e+00> : vector<2x16xf32>
    %61 = vector.multi_reduction <add>, %60, %cst_20 [2] : vector<2x16x16xf32> to vector<2x16xf32>
    %62 = vector.shape_cast %61 : vector<2x16xf32> to vector<2x16x1xf32>
    %63 = tpu.reciprocal %62 {approx = true} : vector<2x16x1xf32> -> vector<2x16x1xf32>
    %64 = vector.broadcast %63 : vector<2x16x1xf32> to vector<2x16x16xf32>
    %65 = arith.mulf %60, %64 : vector<2x16x16xf32>
    %66 = arith.truncf %65 : vector<2x16x16xf32> to vector<2x16x16xbf16>
    "tpu.trace_start"() <{level = 10 : i32, message = "bqk,bkd->bqd"}> : () -> ()
    %cst_21 = arith.constant dense<0.000000e+00> : vector<2x16x32xf32>
    %67 = tpu.matmul %66, %54, %cst_21 {dimension_numbers = #tpu.dot_dimension_numbers<[2], [1], [1], [2], [0, 0, 0, 1, 1, 2], [0], [0]>} : vector<2x16x16xbf16>, vector<2x16x32xbf16>, vector<2x16x32xf32> -> vector<2x16x32xf32>
    "tpu.trace_stop"() : () -> ()
    %68 = vector.shape_cast %67 : vector<2x16x32xf32> to vector<32x32xf32>
    %69 = arith.truncf %68 : vector<32x32xf32> to vector<32x32xbf16>
    %c0_22 = arith.constant 0 : index
    %c0_23 = arith.constant 0 : index
    %70 = vector.load %arg6[%c0_22, %c0_23] : memref<128x128xbf16, #tpu.memory_space<vmem>>, vector<32x128xbf16>
    %cst_24 = arith.constant dense<0.000000e+00> : vector<32x128xf32>
    %71 = tpu.matmul %69, %70, %cst_24 {dimension_numbers = #tpu.dot_dimension_numbers<[1], [0], [0], [1], [0, 0, 1, 1], [], []>} : vector<32x32xbf16>, vector<32x128xbf16>, vector<32x128xf32> -> vector<32x128xf32>
    %72 = arith.addf %45, %71 : vector<32x128xf32>
    %73 = vector.extract_strided_slice %42 {offsets = [0, 32], sizes = [32, 32], strides = [1, 1]} : vector<32x128xf32> to vector<32x32xf32>
    %74 = vector.shape_cast %73 : vector<32x32xf32> to vector<2x16x32xf32>
    %75 = arith.truncf %74 : vector<2x16x32xf32> to vector<2x16x32xbf16>
    %76 = vector.extract_strided_slice %43 {offsets = [0, 32], sizes = [32, 32], strides = [1, 1]} : vector<32x128xf32> to vector<32x32xf32>
    %77 = vector.shape_cast %76 : vector<32x32xf32> to vector<2x16x32xf32>
    %78 = arith.truncf %77 : vector<2x16x32xf32> to vector<2x16x32xbf16>
    %79 = vector.extract_strided_slice %44 {offsets = [0, 32], sizes = [32, 32], strides = [1, 1]} : vector<32x128xf32> to vector<32x32xf32>
    %80 = vector.shape_cast %79 : vector<32x32xf32> to vector<2x16x32xf32>
    %81 = arith.truncf %80 : vector<2x16x32xf32> to vector<2x16x32xbf16>
    "tpu.trace_start"() <{level = 10 : i32, message = "bqd,bkd->bqk"}> : () -> ()
    %cst_25 = arith.constant dense<0.000000e+00> : vector<2x16x16xf32>
    %82 = tpu.matmul %75, %78, %cst_25 {dimension_numbers = #tpu.dot_dimension_numbers<[2], [2], [1], [1], [0, 0, 0, 1, 1, 1], [0], [0]>} : vector<2x16x32xbf16>, vector<2x16x32xbf16>, vector<2x16x16xf32> -> vector<2x16x16xf32>
    "tpu.trace_stop"() : () -> ()
    %cst_26 = arith.constant dense<0xFF800000> : vector<2x16xf32>
    %83 = vector.multi_reduction <maximumf>, %82, %cst_26 [2] : vector<2x16x16xf32> to vector<2x16xf32>
    %84 = vector.shape_cast %83 : vector<2x16xf32> to vector<2x16x1xf32>
    %85 = vector.broadcast %84 : vector<2x16x1xf32> to vector<2x16x16xf32>
    %86 = arith.subf %82, %85 : vector<2x16x16xf32>
    %87 = math.exp %86 : vector<2x16x16xf32>
    %cst_27 = arith.constant dense<0.000000e+00> : vector<2x16xf32>
    %88 = vector.multi_reduction <add>, %87, %cst_27 [2] : vector<2x16x16xf32> to vector<2x16xf32>
    %89 = vector.shape_cast %88 : vector<2x16xf32> to vector<2x16x1xf32>
    %90 = tpu.reciprocal %89 {approx = true} : vector<2x16x1xf32> -> vector<2x16x1xf32>
    %91 = vector.broadcast %90 : vector<2x16x1xf32> to vector<2x16x16xf32>
    %92 = arith.mulf %87, %91 : vector<2x16x16xf32>
    %93 = arith.truncf %92 : vector<2x16x16xf32> to vector<2x16x16xbf16>
    "tpu.trace_start"() <{level = 10 : i32, message = "bqk,bkd->bqd"}> : () -> ()
    %cst_28 = arith.constant dense<0.000000e+00> : vector<2x16x32xf32>
    %94 = tpu.matmul %93, %81, %cst_28 {dimension_numbers = #tpu.dot_dimension_numbers<[2], [1], [1], [2], [0, 0, 0, 1, 1, 2], [0], [0]>} : vector<2x16x16xbf16>, vector<2x16x32xbf16>, vector<2x16x32xf32> -> vector<2x16x32xf32>
    "tpu.trace_stop"() : () -> ()
    %95 = vector.shape_cast %94 : vector<2x16x32xf32> to vector<32x32xf32>
    %96 = arith.truncf %95 : vector<32x32xf32> to vector<32x32xbf16>
    %c32 = arith.constant 32 : index
    %c0_29 = arith.constant 0 : index
    %97 = vector.load %arg6[%c32, %c0_29] : memref<128x128xbf16, #tpu.memory_space<vmem>>, vector<32x128xbf16>
    %cst_30 = arith.constant dense<0.000000e+00> : vector<32x128xf32>
    %98 = tpu.matmul %96, %97, %cst_30 {dimension_numbers = #tpu.dot_dimension_numbers<[1], [0], [0], [1], [0, 0, 1, 1], [], []>} : vector<32x32xbf16>, vector<32x128xbf16>, vector<32x128xf32> -> vector<32x128xf32>
    %99 = arith.addf %72, %98 : vector<32x128xf32>
    %100 = vector.extract_strided_slice %42 {offsets = [0, 64], sizes = [32, 32], strides = [1, 1]} : vector<32x128xf32> to vector<32x32xf32>
    %101 = vector.shape_cast %100 : vector<32x32xf32> to vector<2x16x32xf32>
    %102 = arith.truncf %101 : vector<2x16x32xf32> to vector<2x16x32xbf16>
    %103 = vector.extract_strided_slice %43 {offsets = [0, 64], sizes = [32, 32], strides = [1, 1]} : vector<32x128xf32> to vector<32x32xf32>
    %104 = vector.shape_cast %103 : vector<32x32xf32> to vector<2x16x32xf32>
    %105 = arith.truncf %104 : vector<2x16x32xf32> to vector<2x16x32xbf16>
    %106 = vector.extract_strided_slice %44 {offsets = [0, 64], sizes = [32, 32], strides = [1, 1]} : vector<32x128xf32> to vector<32x32xf32>
    %107 = vector.shape_cast %106 : vector<32x32xf32> to vector<2x16x32xf32>
    %108 = arith.truncf %107 : vector<2x16x32xf32> to vector<2x16x32xbf16>
    "tpu.trace_start"() <{level = 10 : i32, message = "bqd,bkd->bqk"}> : () -> ()
    %cst_31 = arith.constant dense<0.000000e+00> : vector<2x16x16xf32>
    %109 = tpu.matmul %102, %105, %cst_31 {dimension_numbers = #tpu.dot_dimension_numbers<[2], [2], [1], [1], [0, 0, 0, 1, 1, 1], [0], [0]>} : vector<2x16x32xbf16>, vector<2x16x32xbf16>, vector<2x16x16xf32> -> vector<2x16x16xf32>
    "tpu.trace_stop"() : () -> ()
    %cst_32 = arith.constant dense<0xFF800000> : vector<2x16xf32>
    %110 = vector.multi_reduction <maximumf>, %109, %cst_32 [2] : vector<2x16x16xf32> to vector<2x16xf32>
    %111 = vector.shape_cast %110 : vector<2x16xf32> to vector<2x16x1xf32>
    %112 = vector.broadcast %111 : vector<2x16x1xf32> to vector<2x16x16xf32>
    %113 = arith.subf %109, %112 : vector<2x16x16xf32>
    %114 = math.exp %113 : vector<2x16x16xf32>
    %cst_33 = arith.constant dense<0.000000e+00> : vector<2x16xf32>
    %115 = vector.multi_reduction <add>, %114, %cst_33 [2] : vector<2x16x16xf32> to vector<2x16xf32>
    %116 = vector.shape_cast %115 : vector<2x16xf32> to vector<2x16x1xf32>
    %117 = tpu.reciprocal %116 {approx = true} : vector<2x16x1xf32> -> vector<2x16x1xf32>
    %118 = vector.broadcast %117 : vector<2x16x1xf32> to vector<2x16x16xf32>
    %119 = arith.mulf %114, %118 : vector<2x16x16xf32>
    %120 = arith.truncf %119 : vector<2x16x16xf32> to vector<2x16x16xbf16>
    "tpu.trace_start"() <{level = 10 : i32, message = "bqk,bkd->bqd"}> : () -> ()
    %cst_34 = arith.constant dense<0.000000e+00> : vector<2x16x32xf32>
    %121 = tpu.matmul %120, %108, %cst_34 {dimension_numbers = #tpu.dot_dimension_numbers<[2], [1], [1], [2], [0, 0, 0, 1, 1, 2], [0], [0]>} : vector<2x16x16xbf16>, vector<2x16x32xbf16>, vector<2x16x32xf32> -> vector<2x16x32xf32>
    "tpu.trace_stop"() : () -> ()
    %122 = vector.shape_cast %121 : vector<2x16x32xf32> to vector<32x32xf32>
    %123 = arith.truncf %122 : vector<32x32xf32> to vector<32x32xbf16>
    %c64 = arith.constant 64 : index
    %c0_35 = arith.constant 0 : index
    %124 = vector.load %arg6[%c64, %c0_35] : memref<128x128xbf16, #tpu.memory_space<vmem>>, vector<32x128xbf16>
    %cst_36 = arith.constant dense<0.000000e+00> : vector<32x128xf32>
    %125 = tpu.matmul %123, %124, %cst_36 {dimension_numbers = #tpu.dot_dimension_numbers<[1], [0], [0], [1], [0, 0, 1, 1], [], []>} : vector<32x32xbf16>, vector<32x128xbf16>, vector<32x128xf32> -> vector<32x128xf32>
    %126 = arith.addf %99, %125 : vector<32x128xf32>
    %127 = vector.extract_strided_slice %42 {offsets = [0, 96], sizes = [32, 32], strides = [1, 1]} : vector<32x128xf32> to vector<32x32xf32>
    %128 = vector.shape_cast %127 : vector<32x32xf32> to vector<2x16x32xf32>
    %129 = arith.truncf %128 : vector<2x16x32xf32> to vector<2x16x32xbf16>
    %130 = vector.extract_strided_slice %43 {offsets = [0, 96], sizes = [32, 32], strides = [1, 1]} : vector<32x128xf32> to vector<32x32xf32>
    %131 = vector.shape_cast %130 : vector<32x32xf32> to vector<2x16x32xf32>
    %132 = arith.truncf %131 : vector<2x16x32xf32> to vector<2x16x32xbf16>
    %133 = vector.extract_strided_slice %44 {offsets = [0, 96], sizes = [32, 32], strides = [1, 1]} : vector<32x128xf32> to vector<32x32xf32>
    %134 = vector.shape_cast %133 : vector<32x32xf32> to vector<2x16x32xf32>
    %135 = arith.truncf %134 : vector<2x16x32xf32> to vector<2x16x32xbf16>
    "tpu.trace_start"() <{level = 10 : i32, message = "bqd,bkd->bqk"}> : () -> ()
    %cst_37 = arith.constant dense<0.000000e+00> : vector<2x16x16xf32>
    %136 = tpu.matmul %129, %132, %cst_37 {dimension_numbers = #tpu.dot_dimension_numbers<[2], [2], [1], [1], [0, 0, 0, 1, 1, 1], [0], [0]>} : vector<2x16x32xbf16>, vector<2x16x32xbf16>, vector<2x16x16xf32> -> vector<2x16x16xf32>
    "tpu.trace_stop"() : () -> ()
    %cst_38 = arith.constant dense<0xFF800000> : vector<2x16xf32>
    %137 = vector.multi_reduction <maximumf>, %136, %cst_38 [2] : vector<2x16x16xf32> to vector<2x16xf32>
    %138 = vector.shape_cast %137 : vector<2x16xf32> to vector<2x16x1xf32>
    %139 = vector.broadcast %138 : vector<2x16x1xf32> to vector<2x16x16xf32>
    %140 = arith.subf %136, %139 : vector<2x16x16xf32>
    %141 = math.exp %140 : vector<2x16x16xf32>
    %cst_39 = arith.constant dense<0.000000e+00> : vector<2x16xf32>
    %142 = vector.multi_reduction <add>, %141, %cst_39 [2] : vector<2x16x16xf32> to vector<2x16xf32>
    %143 = vector.shape_cast %142 : vector<2x16xf32> to vector<2x16x1xf32>
    %144 = tpu.reciprocal %143 {approx = true} : vector<2x16x1xf32> -> vector<2x16x1xf32>
    %145 = vector.broadcast %144 : vector<2x16x1xf32> to vector<2x16x16xf32>
    %146 = arith.mulf %141, %145 : vector<2x16x16xf32>
    %147 = arith.truncf %146 : vector<2x16x16xf32> to vector<2x16x16xbf16>
    "tpu.trace_start"() <{level = 10 : i32, message = "bqk,bkd->bqd"}> : () -> ()
    %cst_40 = arith.constant dense<0.000000e+00> : vector<2x16x32xf32>
    %148 = tpu.matmul %147, %135, %cst_40 {dimension_numbers = #tpu.dot_dimension_numbers<[2], [1], [1], [2], [0, 0, 0, 1, 1, 2], [0], [0]>} : vector<2x16x16xbf16>, vector<2x16x32xbf16>, vector<2x16x32xf32> -> vector<2x16x32xf32>
    "tpu.trace_stop"() : () -> ()
    %149 = vector.shape_cast %148 : vector<2x16x32xf32> to vector<32x32xf32>
    %150 = arith.truncf %149 : vector<32x32xf32> to vector<32x32xbf16>
    %c96 = arith.constant 96 : index
    %c0_41 = arith.constant 0 : index
    %151 = vector.load %arg6[%c96, %c0_41] : memref<128x128xbf16, #tpu.memory_space<vmem>>, vector<32x128xbf16>
    %cst_42 = arith.constant dense<0.000000e+00> : vector<32x128xf32>
    %152 = tpu.matmul %150, %151, %cst_42 {dimension_numbers = #tpu.dot_dimension_numbers<[1], [0], [0], [1], [0, 0, 1, 1], [], []>} : vector<32x32xbf16>, vector<32x128xbf16>, vector<32x128xf32> -> vector<32x128xf32>
    %153 = arith.addf %126, %152 : vector<32x128xf32>
    %154 = arith.addf %1, %153 : vector<32x128xf32>
    %c0_43 = arith.constant 0 : index
    %c0_44 = arith.constant 0 : index
    %155 = vector.load %arg7[%c0_43, %c0_44] : memref<1x128xf32, #tpu.memory_space<vmem>>, vector<1x128xf32>
    %156 = vector.shape_cast %155 : vector<1x128xf32> to vector<128xf32>
    %157 = vector.shape_cast %156 : vector<128xf32> to vector<1x128xf32>
    %158 = vector.broadcast %157 : vector<1x128xf32> to vector<32x128xf32>
    %159 = arith.addf %154, %158 : vector<32x128xf32>
    %c0_45 = arith.constant 0 : index
    %c0_46 = arith.constant 0 : index
    %160 = vector.load %arg8[%c0_45, %c0_46] : memref<1x128xf32, #tpu.memory_space<vmem>>, vector<1x128xf32>
    %161 = vector.shape_cast %160 : vector<1x128xf32> to vector<128xf32>
    %c0_47 = arith.constant 0 : index
    %c0_48 = arith.constant 0 : index
    %162 = vector.load %arg9[%c0_47, %c0_48] : memref<1x128xf32, #tpu.memory_space<vmem>>, vector<1x128xf32>
    %163 = vector.shape_cast %162 : vector<1x128xf32> to vector<128xf32>
    %cst_49 = arith.constant dense<0.000000e+00> : vector<32xf32>
    %164 = vector.multi_reduction <add>, %159, %cst_49 [1] : vector<32x128xf32> to vector<32xf32>
    %165 = vector.shape_cast %164 : vector<32xf32> to vector<32x1xf32>
    %cst_50 = arith.constant 1.280000e+02 : f32
    %166 = vector.broadcast %cst_50 : f32 to vector<32x1xf32>
    %167 = arith.divf %165, %166 : vector<32x1xf32>
    %168 = arith.mulf %159, %159 : vector<32x128xf32>
    %cst_51 = arith.constant dense<0.000000e+00> : vector<32xf32>
    %169 = vector.multi_reduction <add>, %168, %cst_51 [1] : vector<32x128xf32> to vector<32xf32>
    %170 = vector.shape_cast %169 : vector<32xf32> to vector<32x1xf32>
    %cst_52 = arith.constant 1.280000e+02 : f32
    %171 = vector.broadcast %cst_52 : f32 to vector<32x1xf32>
    %172 = arith.divf %170, %171 : vector<32x1xf32>
    %173 = arith.mulf %167, %167 : vector<32x1xf32>
    %174 = arith.subf %172, %173 : vector<32x1xf32>
    %cst_53 = arith.constant 0.000000e+00 : f32
    %175 = vector.broadcast %cst_53 : f32 to vector<32x1xf32>
    %176 = arith.maximumf %174, %175 : vector<32x1xf32>
    %177 = vector.broadcast %167 : vector<32x1xf32> to vector<32x128xf32>
    %178 = arith.subf %159, %177 : vector<32x128xf32>
    %cst_54 = arith.constant 9.99999974E-6 : f32
    %179 = vector.broadcast %cst_54 : f32 to vector<32x1xf32>
    %180 = arith.addf %176, %179 : vector<32x1xf32>
    %181 = math.rsqrt %180 : vector<32x1xf32>
    %182 = vector.broadcast %181 : vector<32x1xf32> to vector<32x128xf32>
    %183 = arith.mulf %178, %182 : vector<32x128xf32>
    %184 = vector.shape_cast %161 : vector<128xf32> to vector<1x128xf32>
    %185 = vector.broadcast %184 : vector<1x128xf32> to vector<32x128xf32>
    %186 = arith.mulf %183, %185 : vector<32x128xf32>
    %187 = vector.shape_cast %163 : vector<128xf32> to vector<1x128xf32>
    %188 = vector.broadcast %187 : vector<1x128xf32> to vector<32x128xf32>
    %189 = arith.addf %186, %188 : vector<32x128xf32>
    %190 = arith.truncf %189 : vector<32x128xf32> to vector<32x128xbf16>
    %c0_55 = arith.constant 0 : index
    %c0_56 = arith.constant 0 : index
    %191 = vector.load %arg11[%c0_55, %c0_56] : memref<1x512xf32, #tpu.memory_space<vmem>>, vector<1x512xf32>
    %192 = vector.shape_cast %191 : vector<1x512xf32> to vector<512xf32>
    %cst_57 = arith.constant 0.000000e+00 : f32
    %193 = vector.broadcast %cst_57 : f32 to vector<32x128xf32>
    %c0_58 = arith.constant 0 : index
    %c0_59 = arith.constant 0 : index
    %194 = vector.load %arg10[%c0_58, %c0_59] : memref<128x512xbf16, #tpu.memory_space<vmem>>, vector<128x128xbf16>
    %cst_60 = arith.constant dense<0.000000e+00> : vector<32x128xf32>
    %195 = tpu.matmul %190, %194, %cst_60 {dimension_numbers = #tpu.dot_dimension_numbers<[1], [0], [0], [1], [0, 0, 1, 1], [], []>} : vector<32x128xbf16>, vector<128x128xbf16>, vector<32x128xf32> -> vector<32x128xf32>
    %196 = vector.extract_strided_slice %192 {offsets = [0], sizes = [128], strides = [1]} : vector<512xf32> to vector<128xf32>
    %197 = vector.shape_cast %196 : vector<128xf32> to vector<1x128xf32>
    %198 = vector.broadcast %197 : vector<1x128xf32> to vector<32x128xf32>
    %199 = arith.addf %195, %198 : vector<32x128xf32>
    %cst_61 = arith.constant 1.702000e+00 : f32
    %200 = vector.broadcast %cst_61 : f32 to vector<32x128xf32>
    %201 = arith.mulf %200, %199 : vector<32x128xf32>
    %202 = arith.negf %201 : vector<32x128xf32>
    %203 = math.exp %202 : vector<32x128xf32>
    %cst_62 = arith.constant 1.000000e+00 : f32
    %204 = vector.broadcast %cst_62 : f32 to vector<32x128xf32>
    %205 = arith.addf %204, %203 : vector<32x128xf32>
    %206 = arith.divf %204, %205 : vector<32x128xf32>
    %207 = arith.mulf %199, %206 : vector<32x128xf32>
    %208 = arith.truncf %207 : vector<32x128xf32> to vector<32x128xbf16>
    %c0_63 = arith.constant 0 : index
    %c0_64 = arith.constant 0 : index
    %209 = vector.load %arg12[%c0_63, %c0_64] : memref<512x128xbf16, #tpu.memory_space<vmem>>, vector<128x128xbf16>
    %cst_65 = arith.constant dense<0.000000e+00> : vector<32x128xf32>
    %210 = tpu.matmul %208, %209, %cst_65 {dimension_numbers = #tpu.dot_dimension_numbers<[1], [0], [0], [1], [0, 0, 1, 1], [], []>} : vector<32x128xbf16>, vector<128x128xbf16>, vector<32x128xf32> -> vector<32x128xf32>
    %211 = arith.addf %193, %210 : vector<32x128xf32>
    %c0_66 = arith.constant 0 : index
    %c128 = arith.constant 128 : index
    %212 = vector.load %arg10[%c0_66, %c128] : memref<128x512xbf16, #tpu.memory_space<vmem>>, vector<128x128xbf16>
    %cst_67 = arith.constant dense<0.000000e+00> : vector<32x128xf32>
    %213 = tpu.matmul %190, %212, %cst_67 {dimension_numbers = #tpu.dot_dimension_numbers<[1], [0], [0], [1], [0, 0, 1, 1], [], []>} : vector<32x128xbf16>, vector<128x128xbf16>, vector<32x128xf32> -> vector<32x128xf32>
    %214 = vector.extract_strided_slice %192 {offsets = [128], sizes = [128], strides = [1]} : vector<512xf32> to vector<128xf32>
    %215 = vector.shape_cast %214 : vector<128xf32> to vector<1x128xf32>
    %216 = vector.broadcast %215 : vector<1x128xf32> to vector<32x128xf32>
    %217 = arith.addf %213, %216 : vector<32x128xf32>
    %cst_68 = arith.constant 1.702000e+00 : f32
    %218 = vector.broadcast %cst_68 : f32 to vector<32x128xf32>
    %219 = arith.mulf %218, %217 : vector<32x128xf32>
    %220 = arith.negf %219 : vector<32x128xf32>
    %221 = math.exp %220 : vector<32x128xf32>
    %cst_69 = arith.constant 1.000000e+00 : f32
    %222 = vector.broadcast %cst_69 : f32 to vector<32x128xf32>
    %223 = arith.addf %222, %221 : vector<32x128xf32>
    %224 = arith.divf %222, %223 : vector<32x128xf32>
    %225 = arith.mulf %217, %224 : vector<32x128xf32>
    %226 = arith.truncf %225 : vector<32x128xf32> to vector<32x128xbf16>
    %c128_70 = arith.constant 128 : index
    %c0_71 = arith.constant 0 : index
    %227 = vector.load %arg12[%c128_70, %c0_71] : memref<512x128xbf16, #tpu.memory_space<vmem>>, vector<128x128xbf16>
    %cst_72 = arith.constant dense<0.000000e+00> : vector<32x128xf32>
    %228 = tpu.matmul %226, %227, %cst_72 {dimension_numbers = #tpu.dot_dimension_numbers<[1], [0], [0], [1], [0, 0, 1, 1], [], []>} : vector<32x128xbf16>, vector<128x128xbf16>, vector<32x128xf32> -> vector<32x128xf32>
    %229 = arith.addf %211, %228 : vector<32x128xf32>
    %c0_73 = arith.constant 0 : index
    %c256 = arith.constant 256 : index
    %230 = vector.load %arg10[%c0_73, %c256] : memref<128x512xbf16, #tpu.memory_space<vmem>>, vector<128x128xbf16>
    %cst_74 = arith.constant dense<0.000000e+00> : vector<32x128xf32>
    %231 = tpu.matmul %190, %230, %cst_74 {dimension_numbers = #tpu.dot_dimension_numbers<[1], [0], [0], [1], [0, 0, 1, 1], [], []>} : vector<32x128xbf16>, vector<128x128xbf16>, vector<32x128xf32> -> vector<32x128xf32>
    %232 = vector.extract_strided_slice %192 {offsets = [256], sizes = [128], strides = [1]} : vector<512xf32> to vector<128xf32>
    %233 = vector.shape_cast %232 : vector<128xf32> to vector<1x128xf32>
    %234 = vector.broadcast %233 : vector<1x128xf32> to vector<32x128xf32>
    %235 = arith.addf %231, %234 : vector<32x128xf32>
    %cst_75 = arith.constant 1.702000e+00 : f32
    %236 = vector.broadcast %cst_75 : f32 to vector<32x128xf32>
    %237 = arith.mulf %236, %235 : vector<32x128xf32>
    %238 = arith.negf %237 : vector<32x128xf32>
    %239 = math.exp %238 : vector<32x128xf32>
    %cst_76 = arith.constant 1.000000e+00 : f32
    %240 = vector.broadcast %cst_76 : f32 to vector<32x128xf32>
    %241 = arith.addf %240, %239 : vector<32x128xf32>
    %242 = arith.divf %240, %241 : vector<32x128xf32>
    %243 = arith.mulf %235, %242 : vector<32x128xf32>
    %244 = arith.truncf %243 : vector<32x128xf32> to vector<32x128xbf16>
    %c256_77 = arith.constant 256 : index
    %c0_78 = arith.constant 0 : index
    %245 = vector.load %arg12[%c256_77, %c0_78] : memref<512x128xbf16, #tpu.memory_space<vmem>>, vector<128x128xbf16>
    %cst_79 = arith.constant dense<0.000000e+00> : vector<32x128xf32>
    %246 = tpu.matmul %244, %245, %cst_79 {dimension_numbers = #tpu.dot_dimension_numbers<[1], [0], [0], [1], [0, 0, 1, 1], [], []>} : vector<32x128xbf16>, vector<128x128xbf16>, vector<32x128xf32> -> vector<32x128xf32>
    %247 = arith.addf %229, %246 : vector<32x128xf32>
    %c0_80 = arith.constant 0 : index
    %c384 = arith.constant 384 : index
    %248 = vector.load %arg10[%c0_80, %c384] : memref<128x512xbf16, #tpu.memory_space<vmem>>, vector<128x128xbf16>
    %cst_81 = arith.constant dense<0.000000e+00> : vector<32x128xf32>
    %249 = tpu.matmul %190, %248, %cst_81 {dimension_numbers = #tpu.dot_dimension_numbers<[1], [0], [0], [1], [0, 0, 1, 1], [], []>} : vector<32x128xbf16>, vector<128x128xbf16>, vector<32x128xf32> -> vector<32x128xf32>
    %250 = vector.extract_strided_slice %192 {offsets = [384], sizes = [128], strides = [1]} : vector<512xf32> to vector<128xf32>
    %251 = vector.shape_cast %250 : vector<128xf32> to vector<1x128xf32>
    %252 = vector.broadcast %251 : vector<1x128xf32> to vector<32x128xf32>
    %253 = arith.addf %249, %252 : vector<32x128xf32>
    %cst_82 = arith.constant 1.702000e+00 : f32
    %254 = vector.broadcast %cst_82 : f32 to vector<32x128xf32>
    %255 = arith.mulf %254, %253 : vector<32x128xf32>
    %256 = arith.negf %255 : vector<32x128xf32>
    %257 = math.exp %256 : vector<32x128xf32>
    %cst_83 = arith.constant 1.000000e+00 : f32
    %258 = vector.broadcast %cst_83 : f32 to vector<32x128xf32>
    %259 = arith.addf %258, %257 : vector<32x128xf32>
    %260 = arith.divf %258, %259 : vector<32x128xf32>
    %261 = arith.mulf %253, %260 : vector<32x128xf32>
    %262 = arith.truncf %261 : vector<32x128xf32> to vector<32x128xbf16>
    %c384_84 = arith.constant 384 : index
    %c0_85 = arith.constant 0 : index
    %263 = vector.load %arg12[%c384_84, %c0_85] : memref<512x128xbf16, #tpu.memory_space<vmem>>, vector<128x128xbf16>
    %cst_86 = arith.constant dense<0.000000e+00> : vector<32x128xf32>
    %264 = tpu.matmul %262, %263, %cst_86 {dimension_numbers = #tpu.dot_dimension_numbers<[1], [0], [0], [1], [0, 0, 1, 1], [], []>} : vector<32x128xbf16>, vector<128x128xbf16>, vector<32x128xf32> -> vector<32x128xf32>
    %265 = arith.addf %247, %264 : vector<32x128xf32>
    %266 = arith.addf %159, %265 : vector<32x128xf32>
    %c0_87 = arith.constant 0 : index
    %c0_88 = arith.constant 0 : index
    %267 = vector.load %arg13[%c0_87, %c0_88] : memref<1x128xf32, #tpu.memory_space<vmem>>, vector<1x128xf32>
    %268 = vector.shape_cast %267 : vector<1x128xf32> to vector<128xf32>
    %269 = vector.shape_cast %268 : vector<128xf32> to vector<1x128xf32>
    %270 = vector.broadcast %269 : vector<1x128xf32> to vector<32x128xf32>
    %271 = arith.addf %266, %270 : vector<32x128xf32>
    %272 = vector.shape_cast %271 : vector<32x128xf32> to vector<2x16x128xf32>
    %c0_89 = arith.constant 0 : index
    %c0_90 = arith.constant 0 : index
    %c0_91 = arith.constant 0 : index
    %273 = vector.load %arg14[%c0_89, %c0_90, %c0_91] : memref<2x16x128xf32, #tpu.memory_space<vmem>>, vector<2x16x128xf32>
    tpu.vector_store %arg14[%c0_89, %c0_90, %c0_91], %272 {strides = array<i32>} : memref<2x16x128xf32, #tpu.memory_space<vmem>>, vector<2x16x128xf32>,
    return
  }
  func.func @transform_0(%arg0: i32) -> (i32, i32, i32) {
    %c0_i32 = arith.constant 0 : i32
    %c0_i32_0 = arith.constant 0 : i32
    %c0_i32_1 = arith.constant 0 : i32
    return %arg0, %c0_i32, %c0_i32_0 : i32, i32, i32
  }
  func.func @transform_1(%arg0: i32) -> (i32, i32) {
    %c0_i32 = arith.constant 0 : i32
    %c0_i32_0 = arith.constant 0 : i32
    %c0_i32_1 = arith.constant 0 : i32
    return %c0_i32, %c0_i32_0 : i32, i32
  }
  func.func @transform_2(%arg0: i32) -> (i32, i32) {
    %c0_i32 = arith.constant 0 : i32
    %c0_i32_0 = arith.constant 0 : i32
    %c0_i32_1 = arith.constant 0 : i32
    return %c0_i32, %c0_i32_0 : i32, i32
  }
  func.func @transform_3(%arg0: i32) -> (i32, i32) {
    %c0_i32 = arith.constant 0 : i32
    %c0_i32_0 = arith.constant 0 : i32
    %c0_i32_1 = arith.constant 0 : i32
    return %c0_i32, %c0_i32_0 : i32, i32
  }
  func.func @transform_4(%arg0: i32) -> (i32, i32) {
    %c0_i32 = arith.constant 0 : i32
    %c0_i32_0 = arith.constant 0 : i32
    %c0_i32_1 = arith.constant 0 : i32
    return %c0_i32, %c0_i32_0 : i32, i32
  }
  func.func @transform_5(%arg0: i32) -> (i32, i32) {
    %c0_i32 = arith.constant 0 : i32
    %c0_i32_0 = arith.constant 0 : i32
    %c0_i32_1 = arith.constant 0 : i32
    return %c0_i32, %c0_i32_0 : i32, i32
  }
  func.func @transform_6(%arg0: i32) -> (i32, i32) {
    %c0_i32 = arith.constant 0 : i32
    %c0_i32_0 = arith.constant 0 : i32
    %c0_i32_1 = arith.constant 0 : i32
    return %c0_i32, %c0_i32_0 : i32, i32
  }
  func.func @transform_7(%arg0: i32) -> (i32, i32) {
    %c0_i32 = arith.constant 0 : i32
    %c0_i32_0 = arith.constant 0 : i32
    %c0_i32_1 = arith.constant 0 : i32
    return %c0_i32, %c0_i32_0 : i32, i32
  }
  func.func @transform_8(%arg0: i32) -> (i32, i32) {
    %c0_i32 = arith.constant 0 : i32
    %c0_i32_0 = arith.constant 0 : i32
    %c0_i32_1 = arith.constant 0 : i32
    return %c0_i32, %c0_i32_0 : i32, i32
  }
  func.func @transform_9(%arg0: i32) -> (i32, i32) {
    %c0_i32 = arith.constant 0 : i32
    %c0_i32_0 = arith.constant 0 : i32
    %c0_i32_1 = arith.constant 0 : i32
    return %c0_i32, %c0_i32_0 : i32, i32
  }
  func.func @transform_10(%arg0: i32) -> (i32, i32) {
    %c0_i32 = arith.constant 0 : i32
    %c0_i32_0 = arith.constant 0 : i32
    %c0_i32_1 = arith.constant 0 : i32
    return %c0_i32, %c0_i32_0 : i32, i32
  }
  func.func @transform_11(%arg0: i32) -> (i32, i32) {
    %c0_i32 = arith.constant 0 : i32
    %c0_i32_0 = arith.constant 0 : i32
    %c0_i32_1 = arith.constant 0 : i32
    return %c0_i32, %c0_i32_0 : i32, i32
  }
  func.func @transform_12(%arg0: i32) -> (i32, i32) {
    %c0_i32 = arith.constant 0 : i32
    %c0_i32_0 = arith.constant 0 : i32
    %c0_i32_1 = arith.constant 0 : i32
    return %c0_i32, %c0_i32_0 : i32, i32
  }
  func.func @transform_13(%arg0: i32) -> (i32, i32, i32) {
    %c0_i32 = arith.constant 0 : i32
    %c0_i32_0 = arith.constant 0 : i32
    %c0_i32_1 = arith.constant 0 : i32
    return %arg0, %c0_i32, %c0_i32_0 : i32, i32, i32
  }
}

</mosaic_0001>

<bundles_post_ra>
// kernel: tpu_custom_call.1
= control target key start
LH: loop header
LB: loop body
LE: loop exit
PB: predicated region body
PF: predicated region fallthrough
CT: control target
= control target key end

     0   :  { %s5484_s0 = inlined_call_operand.hbm [shape: f32[4,16,128], index: 0, kind: input, shape index: {}]   ;;  %s5485_s1 = inlined_call_operand.hbm [shape: f32[1,128], index: 1, kind: input, shape index: {}]   ;;  %s5486_s2 = inlined_call_operand.hbm [shape: f32[1,128], index: 2, kind: input, shape index: {}]   ;;  %s5487_s3 = inlined_call_operand.hbm [shape: bf16[128,384], index: 3, kind: input, shape index: {}]   ;;  %s5488_s4 = inlined_call_operand.vmem [shape: f32[1,384], index: 4, kind: input, shape index: {}]   ;;  %s5489_s5 = inlined_call_operand.hbm [shape: bf16[128,128], index: 5, kind: input, shape index: {}]   ;;  %s5490_s6 = inlined_call_operand.vmem [shape: f32[1,128], index: 6, kind: input, shape index: {}]   ;;  %s5491_s7 = inlined_call_operand.vmem [shape: f32[1,128], index: 7, kind: input, shape index: {}]   ;;  %s5492_s8 = inlined_call_operand.vmem [shape: f32[1,128], index: 8, kind: input, shape index: {}]   ;;  %s5493_s9 = inlined_call_operand.hbm [shape: bf16[128,512], index: 9, kind: input, shape index: {}]   ;;  %s5494_s10 = inlined_call_operand.vmem [shape: f32[1,512], index: 10, kind: input, shape index: {}]   ;;  %s5495_s11 = inlined_call_operand.hbm [shape: bf16[512,128], index: 11, kind: input, shape index: {}]   ;;  %s5496_s12 = inlined_call_operand.vmem [shape: f32[1,128], index: 12, kind: input, shape index: {}]   ;;  %s5497_s13 = inlined_call_operand.hbm [shape: f32[4,16,128], index: 13, kind: output, shape index: {}]  }
   0x1   :  { %5502 = sst [smem:[#allocation21_spill]] %s5485_s1 }
   0x2   :  { %5503 = sst [smem:[#allocation22_spill]] %s5486_s2 }
   0x3   :  { %5504 = sst [smem:[#allocation23_spill]] %s5487_s3 }
   0x4   :  { %5505 = sst [smem:[#allocation24_spill]] %s5489_s5 }
   0x5   :  { %5506 = sst [smem:[#allocation25_spill]] %s5493_s9 }
   0x6   :  { %5507 = sst [smem:[#allocation26_spill]] %s5495_s11 }
   0x7   :  { %18 = vsyncpa [#allocation3], 0 }
   0x8   :  { %20 = vsyncpa [#allocation3 + $0x1], 0 }
   0x9   :  { %21 = vsyncpa [#allocation6], 0 }
   0xa   :  { %22 = vsyncpa [#allocation9], 0 }
   0xb   :  { %23 = vsyncpa [#allocation12], 0 }
   0xc   :  { %24 = vsyncpa [#allocation4], 0 }
   0xd   :  { %26 = vsyncpa [#allocation4 + $0x1], 0  ;;  %s4865_s25 = smov 0   ;;  %s4867_s26 = smov 0  }
   0xe   :  { %s4869_s27 = smov 0   ;;  %s4871_s28 = smov 0  }
   0xf LB: > { %s4771_s29 = smov [#allocation5]   ;;  %s4886_s14 = sadd.s32 4294967295, %s4769_s28   ;;  %s4769_s28 = sphi %s4871_s28, %s5539_s28   ;;  %s4765_s27 = sphi %s4869_s27, %s5538_s27   ;;  %s4761_s26 = sphi %s4867_s26, %s5537_s26   ;;  %s4757_s25 = sphi %s4865_s25, %s5536_s25  }
  0x10   : > { %s354_s30 = sshll.u32 %s4771_s29, 4  ;;  %p3515_p0 = scmp.ge.s32.totalorder %s4769_s28, 1  ;;  %s355_s30 = int_to_ptr.vmem [resolvable:$true] %s354_s30 }
  0x11   : > { %p5498_p1 = scmp.eq.s32.totalorder %s4886_s14, 0  ;;  %p341_p2 = scmp.lt.s32.totalorder %s4769_s28, 3 }
  0x12   : > { %s4772_s16 = smov [#allocation8]   ;;  %s4773_s19 = smov [#allocation11]  }
  0x13   : > { %p4891_p3 = pnand %p3515_p0, %p341_p2  ;;  %s375_s17 = sshll.u32 %s4772_s16, 4  ;;  %s4898_s17 = int_to_ptr.vmem [resolvable:$true] %s375_s17 }
  0x14   : > { %s413_s20 = sshll.u32 %s4773_s19, 4  ;;  %s4520_s22 = scalar_lea.vmem %s355_s30, 16  ;;  %s4906_s20 = int_to_ptr.vmem [resolvable:$true] %s413_s20 }
  0x15   : > { %s5508_s15 = scalar_select %p4891_p3, 1, 0 }
  0x16   : > { %p4162_p5 = pneg %p4891_p3  ;;  %p4521_p8 = scmp.ne.s32.totalorder %s355_s30, %s4520_s22 }
  0x17   : > { %s4527_s23 = scalar_lea.vmem %s355_s30, 32  ;;  %p4528_p11 = scmp.lt.s32.totalorder %s355_s30, %s355_s30 }
  0x18   : > { %p4902_p6 = pnand %p4162_p5, %p5498_p1  ;;  %p4529_p12 = scmp.lt.s32.totalorder %s4527_s23, %s4520_s22 }
  0x1a   : > { %p4910_p7 = pneg %p4902_p6  ;;  %p4530_p13 = por %p4529_p12, %p4528_p11 }
  0x1c   : > { %p4523_p9 = pnand %p4521_p8, %p4910_p7 }
  0x1e   : > { %p4524_p10 = pneg %p4523_p9 }
  0x20   : > { %p4531_p0 = pnand %p4530_p13, %p4524_p10 }
  0x22   : > { %4534 = shalt.err (!%p4531_p0)
}
  0x23   : > { %s5511_s1 = sld [smem:[#allocation21_spill]]  ;;  %s4546_s16 = scalar_lea.vmem %s4898_s17, 3072 }
  0x24   : > { %p4547_p2 = scmp.ne.s32.totalorder %s4898_s17, %s4546_s16  ;;  %p4554_p9 = scmp.lt.s32.totalorder %s4898_s17, %s4898_s17 }
  0x25   : > { %p4555_p11 = scmp.lt.s32.totalorder %s4546_s16, %s4546_s16 }
  0x26   : > { %p4549_p5 = pnand %p4547_p2, %p4910_p7 }
  0x27   : > { %p4556_p10 = por %p4555_p11, %p4554_p9 }
  0x28   : > { %p4550_p8 = pneg %p4549_p5 }
  0x29   : > { %4165 = dma.hbm_to_vmem [thread:$0]  (!%p4902_p6), %s5511_s1, 16, %s355_s30, [#allocation6]  }
  0x2a   : > { %p4557_p12 = pnand %p4556_p10, %p4550_p8 }
  0x2c   : > { %4560 = shalt.err (!%p4557_p12)
}
  0x2d   : > { %s4774_s19 = smov 192   ;;  %s4775_s22 = smov 12  }
  0x2e   : > { %s5512_s3 = sld [smem:[#allocation23_spill]]  ;;  %s4572_s24 = scalar_lea.vmem %s4906_s20, 4096 }
  0x2f   : > { %p4573_p13 = scmp.ne.s32.totalorder %s4906_s20, %s4572_s24  ;;  %p4580_p5 = scmp.lt.s32.totalorder %s4906_s20, %s4906_s20 }
  0x30   : > { %p4581_p8 = scmp.lt.s32.totalorder %s4572_s24, %s4572_s24 }
  0x31   : > { %p4575_p0 = pnand %p4573_p13, %p4910_p7 }
  0x32   : > { %p4582_p9 = por %p4581_p8, %p4580_p5 }
  0x33   : > { %p4576_p2 = pneg %p4575_p0 }
  0x34   : > { %4171 = dma.hbm_to_vmem [thread:$0]  (!%p4902_p6), %s5512_s3, 3072, %s4898_s17, [#allocation9], %s4774_s19, %s4774_s19, %s4775_s22  }
  0x35   : > { %p4583_p11 = pnand %p4582_p9, %p4576_p2 }
  0x37   : > { %4586 = shalt.err (!%p4583_p11)
}
  0x38   : > { %s4776_s29 = smov 256   ;;  %s4777_s16 = smov 16  }
  0x39   : > { %s5513_s9 = sld [smem:[#allocation25_spill]]  ;;  %s4778_s17 = smov [#allocation7]  }
  0x3a   : > { %s365_s19 = sshll.u32 %s4778_s17, 4  ;;  %s4779_s22 = smov [#allocation10]   ;;  %s366_s19 = int_to_ptr.vmem [resolvable:$true] %s365_s19 }
  0x3b   : > { %s391_s23 = sshll.u32 %s4779_s22, 4  ;;  %s4598_s3 = scalar_lea.vmem %s366_s19, 16  ;;  %s392_s23 = int_to_ptr.vmem [resolvable:$true] %s391_s23 }
  0x3c   : > { %p4599_p10 = scmp.ne.s32.totalorder %s366_s19, %s4598_s3  ;;  %s4605_s24 = scalar_lea.vmem %s366_s19, 32 }
  0x3d   : > { %p4606_p0 = scmp.lt.s32.totalorder %s366_s19, %s366_s19  ;;  %p4607_p2 = scmp.lt.s32.totalorder %s4605_s24, %s4598_s3 }
  0x3e   : > { %p4601_p12 = pnand %p4599_p10, %p4910_p7 }
  0x3f   : > { %4177 = dma.hbm_to_vmem [thread:$0]  (!%p4902_p6), %s5513_s9, 4096, %s4906_s20, [#allocation12], %s4776_s29, %s4776_s29, %s4777_s16  }
  0x40   : > { %p4602_p13 = pneg %p4601_p12  ;;  %p4608_p5 = por %p4607_p2, %p4606_p0 }
  0x42   : > { %p4609_p8 = pnand %p4608_p5, %p4602_p13 }
  0x44   : > { %4612 = shalt.err (!%p4609_p8)
}
  0x45   : > { %s5514_s2 = sld [smem:[#allocation22_spill]]  ;;  %s4624_s29 = scalar_lea.vmem %s392_s23, 1024 }
  0x46   : > { %p4625_p9 = scmp.ne.s32.totalorder %s392_s23, %s4624_s29  ;;  %p4632_p12 = scmp.lt.s32.totalorder %s392_s23, %s392_s23 }
  0x47   : > { %p4633_p4 = scmp.lt.s32.totalorder %s4624_s29, %s4624_s29 }
  0x48   : > { %p4627_p11 = pnand %p4625_p9, %p4910_p7 }
  0x49   : > { %p4634_p1 = por %p4633_p4, %p4632_p12 }
  0x4a   : > { %p4628_p10 = pneg %p4627_p11 }
  0x4b   : > { %4168 = dma.hbm_to_vmem [thread:$0]  (!%p4902_p6), %s5514_s2, 16, %s366_s19, [#allocation6]  }
  0x4c   : > { %p4635_p3 = pnand %p4634_p1, %p4628_p10 }
  0x4e   : > { %4638 = shalt.err (!%p4635_p3)
}
  0x4f   : > { %s4780_s3 = smov 64   ;;  %s4781_s16 = smov 4  }
  0x50   : > { %s5515_s5 = sld [smem:[#allocation24_spill]]  ;;  %s4782_s19 = smov [#allocation13]  }
  0x51   : > { %s429_s22 = sshll.u32 %s4782_s19, 4  ;;  %s430_s22 = int_to_ptr.vmem [resolvable:$true] %s429_s22 }
  0x52   : > { %s4650_s24 = scalar_lea.vmem %s430_s22, 4096  ;;  %p4658_p4 = scmp.lt.s32.totalorder %s430_s22, %s430_s22 }
  0x53   : > { %p4651_p13 = scmp.ne.s32.totalorder %s430_s22, %s4650_s24  ;;  %p4659_p1 = scmp.lt.s32.totalorder %s4650_s24, %s4650_s24 }
  0x55   : > { %p4653_p0 = pnand %p4651_p13, %p4910_p7  ;;  %p4660_p3 = por %p4659_p1, %p4658_p4 }
  0x56   : > { %4174 = dma.hbm_to_vmem [thread:$0]  (!%p4902_p6), %s5515_s5, 1024, %s392_s23, [#allocation9], %s4780_s3, %s4780_s3, %s4781_s16  }
  0x57   : > { %p4654_p2 = pneg %p4653_p0 }
  0x59   : > { %p4661_p5 = pnand %p4660_p3, %p4654_p2 }
  0x5b   : > { %4664 = shalt.err (!%p4661_p5)
}
  0x5c   : > { %s5516_s11 = sld [smem:[#allocation26_spill]]  ;;  %s3514_s21 = sadd.s32 4294967294, %s4769_s28  }
  0x5d   : > { %s4968_s18 = sadd.s32 1, %s4769_s28   ;;  %s39_s29 = sadd.s32 1, %s4765_s27 }
  0x5e   : > { %s36_s23 = ssub.s32 %s4769_s28, %s4968_s18  ;;  %p46_p8 = scmp.ne.s32.totalorder %s4765_s27, %s4761_s26 }
  0x5f   : > { %p37_p7 = scmp.eq.s32.totalorder %s36_s23, 0  ;;  %p47_p9 = scmp.eq.s32.totalorder %s4769_s28, 0 }
  0x60   : > { %p52_p11 = scmp.ne.s32.totalorder %s4761_s26, %s4757_s25  ;;  %p5519_p12 = scmp.eq.s32.totalorder %s4886_s14, 0 }
  0x61   : > { %s4979_s30 = scalar_select %p37_p7, %s4765_s27, %s39_s29  }
  0x62   : > { %4180 = dma.hbm_to_vmem [thread:$0]  (!%p4902_p6), %s5516_s11, 4096, %s430_s22, [#allocation12], %s4780_s3, %s4780_s3, %s4781_s16  }
  0x63   : > { %5517 = sst [smem:[#allocation20_spill]] %s4979_s30  ;;  %p4981_p10 = por %p47_p9, %p46_p8 }
  0x64   : > { %p4987_p6 = por %p5519_p12, %p52_p11  ;;  %p328_p13 = scmp.eq.s32.totalorder %s4886_s14, 1 }
  0x65   : > { %p334_p0 = scmp.eq.s32.totalorder %s3514_s21, 1  ;;  %p4195_p2 = scmp.lt.s32.totalorder %s4769_s28, 2 }
  0x66   : > { %s5520_s3 = scalar_select %p4987_p6, 1, 0 }
  0x67   : > { %s446_s16 = sand.u32 1, %s4765_s27   ;;  %p4994_p4 = por %p328_p13, %p46_p8 }
  0x68   : > { %p4998_p1 = por %p334_p0, %p52_p11  ;;  %s3523_s24 = sshll.u32 %s446_s16, 5 }
  0x69   : > { %s5521_s19 = scalar_select %p4994_p4, 1, 0 }
  0x6a   : > { %s5522_s22 = scalar_select %p4998_p1, 1, 0 }
  0x6b   : > { %s3685_s1 = sshll.u32 %s4769_s28, 9  ;;  %s450_s21 = scalar_lea.vmem [#allocation2], %s3523_s24 }
  0x6c   : > { %s5006_s29 = scalar_lea.hbm %s5484_s0, %s3685_s1  ;;  %s458_s2 = sshll.u32 %s450_s21, 4  ;;  %s5008_s2 = int_to_ptr.vmem [resolvable:$true] %s458_s2 }
  0x6d   : > { %p5012_p3 = pnand %p4195_p2, %p4981_p10  ;;  %s5016_s9 = scalar_lea.sflag [#allocation3], %s446_s16 }
  0x6e   : > { %s4665_s11 = scalar_lea.hbm %s5006_s29, 512  ;;  %s4670_s24 = scalar_lea.hbm %s5484_s0, 1024 }
  0x6f   : > { %p4666_p5 = scmp.ne.s32.totalorder %s5006_s29, %s4665_s11  ;;  %p4667_p7 = pneg %p5012_p3 }
  0x70   : > { %p4671_p11 = scmp.lt.s32.totalorder %s5006_s29, %s5484_s0  ;;  %p4672_p10 = scmp.lt.s32.totalorder %s4670_s24, %s4665_s11 }
  0x71   : > { %p4668_p8 = pnand %p4667_p7, %p4666_p5 }
  0x72   : > { %p4673_p12 = por %p4672_p10, %p4671_p11 }
  0x73   : > { %p4669_p9 = pneg %p4668_p8 }
  0x75   : > { %p4674_p13 = pnand %p4673_p12, %p4669_p9 }
  0x77   : > { %4677 = shalt.err (!%p4674_p13)
}
  0x78   : > { %s4678_s17 = scalar_lea.vmem %s5008_s2, 512  ;;  %s4783_s16 = smov [#allocation2]  }
  0x79   : > { %p4679_p0 = scmp.ne.s32.totalorder %s5008_s2, %s4678_s17  ;;  %s4683_s30 = sshll.u32 %s4783_s16, 4  ;;  %s4684_s30 = int_to_ptr.vmem [resolvable:$false] %s4683_s30 }
  0x7a   : > { %s4685_s1 = scalar_lea.vmem %s4684_s30, 1024  ;;  %p4686_p8 = scmp.lt.s32.totalorder %s5008_s2, %s4684_s30 }
  0x7b   : > { %p4681_p2 = pnand %p4679_p0, %p4667_p7  ;;  %p4687_p1 = scmp.lt.s32.totalorder %s4685_s1, %s4678_s17 }
  0x7d   : > { %p4682_p5 = pneg %p4681_p2  ;;  %p4688_p4 = por %p4687_p1, %p4686_p8 }
  0x7f   : > { %p4689_p6 = pnand %p4688_p4, %p4682_p5 }
  0x81   : > { %4692 = shalt.err (!%p4689_p6)
}
  0x82   : > { %s4784_s11 = smov 128   ;;  %s4785_s20 = smov 8  }
  0x83   : > { %4184 = dma.hbm_to_vmem [thread:$0]  (!%p5012_p3), %s5006_s29, 512, %s5008_s2, %s5016_s9, %s4784_s11, %s4784_s11, %s4785_s20  }
  0x84   : > { %p5524_p7 = scmp.ne.s32.totalorder %s5508_s15, 0 }
  0x85   : > { %s5040_s24 = sand.u32 (!%p5524_p7), 1, %s4761_s26   ;;  %p5525_p6 = scmp.ne.s32.totalorder (!%p5524_p7), %s5520_s3, 0 }
  0x86   : > { %470 = sbr.rel (%p5524_p7) target bundleno = 4409 (0x1139), region = 72  ;;  %s3528_s30 = sshll.u32 (!%p5524_p7), %s5040_s24, 5 }
  0x87   : > { %s473_s23 = scalar_lea.sflag (!%p5524_p7), [#allocation3], %s5040_s24  ;;  %s5046_s21 = scalar_lea.vmem (!%p5524_p7), [#allocation2], %s3528_s30 }
  0x8b   : > { %4736 = dma.done.wait (%p5525_p6), %s473_s23, 512  }
  0x8c   : > { %4738 = vsyncadd (%p5525_p6), %s473_s23, 4294966784  ;;  %p5526_p4 = scmp.eq.s32.totalorder %s4886_s14, 0 }
  0x8e   : > { %4740 = dma.done.wait (%p5526_p4), [#allocation6], 32   ;;  %p5527_p1 = pmov %p5526_p4 }
  0x90   : > { %4742 = vsyncadd (%p5527_p1), [#allocation6], 4294967264  ;;  %p5528_p3 = pmov %p5527_p1 }
  0x91   : > { %p5529_p9 = pmov %p5527_p1 }
  0x92   : > { %4744 = dma.done.wait (%p5528_p3), [#allocation9], 4096  }
  0x93   : > { %4746 = vsyncadd (%p5529_p9), [#allocation9], 4294963200  ;;  %p5530_p11 = pmov %p5527_p1 }
  0x94   : > { %p5531_p10 = pmov %p5527_p1 }
  0x95   : > { %4748 = dma.done.wait (%p5530_p11), [#allocation12], 8192  }
  0x96   : > { %4750 = vsyncadd (%p5531_p10), [#allocation12], 4294959104  ;;  %v5065_v0 = vld [vmem:[%s5046_s21] sm:$0xff]  ;;  %v5068_v1 = vld [vmem:[%s5046_s21 + $0x8] sm:$0xff]  ;;  %v4786_v27 = vmov 0   ;;  %vm4788_vm0 = vmmov 0  }
  0x97   : > { %552 = vadd.xlane.f32.xlu0 %v5065_v0  ;;  %v565_v2 = vmul.f32 %v5065_v0, %v5065_v0  ;;  %v566_v3 = vmul.f32 %v5068_v1, %v5068_v1  ;;  %v5076_v4 = vld [vmem:[%s5046_s21 + $0x10] sm:$0xff]  ;;  %v5080_v5 = vld [vmem:[%s5046_s21 + $0x18] sm:$0xff]  ;;  %v4263_v12 = vld [vmem:[#allocation8 + $0x7c] ss:$12 sps:$4 sm:$0xff]   ;;  %840 = vmatprep.mubr.bf16.mxu0 %v4786_v27  ;;  %vm920_vm1 = vcmask 261120   ;;  %vm1015_vm2 = vcmask 130048  }
  0x98   : > { %v567_v6 = vmul.f32 %v5076_v4, %v5076_v4  ;;  %v568_v7 = vmul.f32 %v5080_v5, %v5080_v5  ;;  %v4257_v8 = vld [vmem:[#allocation8 + $0xac] ss:$12 sps:$4 sm:$0xff]   ;;  %v4259_v9 = vld [vmem:[#allocation8 + $0xa8] ss:$12 sps:$4 sm:$0xff]   ;;  %v4262_v11 = vld [vmem:[#allocation8 + $0x90] ss:$12 sps:$4 sm:$0xff]  }
  0x99   : > { %569 = vadd.xlane.f32.xlu1 %v565_v2  ;;  %808 = vmatprep.subr.bf16.mxu0 %v4257_v8  ;;  %v4260_v10 = vld [vmem:[#allocation8 + $0x94] ss:$12 sps:$4 sm:$0xff]   ;;  %v4265_v13 = vld [vmem:[#allocation8 + $0x78] ss:$12 sps:$4 sm:$0xff]   ;;  %v4272_v18 = vld [vmem:[#allocation8 + $0xb0] ss:$12 sps:$4 sm:$0xff]  }
  0x9a   : > { %809 = vmatpush1.bf16.msra.mxu0 %v4259_v9  ;;  %v4266_v14 = vld [vmem:[#allocation8 + $0x64] ss:$12 sps:$4 sm:$0xff]   ;;  %v4268_v15 = vld [vmem:[#allocation8 + $0x60] ss:$12 sps:$4 sm:$0xff]   ;;  %v4271_v17 = vld [vmem:[#allocation8 + $0x48] ss:$12 sps:$4 sm:$0xff]   ;;  %3826 = vmatprep.subr.bf16.mxu1 %v4272_v18 }
  0x9b   : > { %554 = vadd.xlane.f32.xlu0 %v5068_v1  ;;  %810 = vmatprep.subr.bf16.mxu0 %v4260_v10  ;;  %v4269_v16 = vld [vmem:[#allocation8 + $0x4c] ss:$12 sps:$4 sm:$0xff]   ;;  %v4273_v19 = vld [vmem:[#allocation8 + $0x34] ss:$12 sps:$4 sm:$0xff]   ;;  %v4275_v20 = vld [vmem:[#allocation8 + $0x30] ss:$12 sps:$4 sm:$0xff]  }
  0x9c   : > { %v4276_v21 = vld [vmem:[#allocation8 + $0x98] ss:$12 sps:$4 sm:$0xff]   ;;  %v4277_v22 = vld [vmem:[#allocation8 + $0x1c] ss:$12 sps:$4 sm:$0xff]   ;;  %3827 = vmatpush3.bf16.msra.mxu1 %v4272_v18  ;;  %v4280_v24 = vld [vmem:[#allocation8 + $0x80] ss:$12 sps:$4 sm:$0xff]  }
  0x9d   : > { %571 = vadd.xlane.f32.xlu1 %v566_v3  ;;  %v4279_v23 = vld [vmem:[#allocation8 + $0x18] ss:$12 sps:$4 sm:$0xff]   ;;  %3828 = vmatprep.subr.bf16.mxu1 %v4276_v21  ;;  %v4283_v26 = vld [vmem:[#allocation8] ss:$12 sps:$4 sm:$0xff]   ;;  %v4284_v28 = vld [vmem:[#allocation8 + $0x68] ss:$12 sps:$4 sm:$0xff]  }
  0x9e   : > { %811 = vmatpush1.bf16.msra.mxu0 %v4262_v11  ;;  %v4281_v25 = vld [vmem:[#allocation8 + $0x4] ss:$12 sps:$4 sm:$0xff]   ;;  %v4287_v31 = vld [vmem:[#allocation8 + $0x20] ss:$12 sps:$4 sm:$0xff]   ;;  %v4288_v32 = vld [vmem:[#allocation8 + $0x8] ss:$12 sps:$4 sm:$0xff]  }
  0x9f   : > { %556 = vadd.xlane.f32.xlu0 %v5076_v4  ;;  %812 = vmatprep.subr.bf16.mxu0 %v4263_v12  ;;  %v4285_v29 = vld [vmem:[#allocation8 + $0x50] ss:$12 sps:$4 sm:$0xff]   ;;  %v4286_v30 = vld [vmem:[#allocation8 + $0x38] ss:$12 sps:$4 sm:$0xff]   ;;  %s4789_s9 = smov 96   ;;  %s4790_s15 = smov 64  }
  0xa0   : > { %3829 = vmatpush3.bf16.msra.mxu1 %v4276_v21  ;;  %v3536_v8 = vld [vmem:[#allocation5] ss:$0 sm:$0xff]  ;;  %s4791_s3 = smov 32   ;;  %s3370_s16 = scalar_lea.sflag [#allocation4], %s5040_s24 }
  0xa1   : > { %558 = vadd.xlane.f32.xlu1 %v5080_v5  ;;  %3830 = vmatprep.subr.bf16.mxu1 %v4280_v24  ;;  %p5532_p13 = scmp.ne.s32.totalorder %s5521_s19, 0 }
  0xa2   : > { %813 = vmatpush1.bf16.msra.mxu0 %v4265_v13  ;;  %v3537_v13 = vld [vmem:[#allocation7] ss:$0 sm:$0xff] }
  0xa3   : > { %573 = vadd.xlane.f32.xlu0 %v567_v6  ;;  %814 = vmatprep.subr.bf16.mxu0 %v4266_v14 }
  0xa4   : > { %3831 = vmatpush3.bf16.msra.mxu1 %v4280_v24 }
  0xa5   : > { %575 = vadd.xlane.f32.xlu1 %v568_v7  ;;  %3832 = vmatprep.subr.bf16.mxu1 %v4284_v28 }
  0xa6   : > { %815 = vmatpush1.bf16.msra.mxu0 %v4268_v15 }
  0xa7   : > { %816 = vmatprep.subr.bf16.mxu0 %v4269_v16 }
  0xa8   : > { %3833 = vmatpush3.bf16.msra.mxu1 %v4284_v28 }
  0xa9   : > { %3834 = vmatprep.subr.bf16.mxu1 %v4285_v29 }
  0xaa   : > { %817 = vmatpush1.bf16.msra.mxu0 %v4271_v17 }
  0xab   : > { %818 = vmatprep.subr.bf16.mxu0 %v4273_v19 }
  0xac   : > { %3835 = vmatpush3.bf16.msra.mxu1 %v4285_v29 }
  0xad   : > { %3836 = vmatprep.subr.bf16.mxu1 %v4286_v30 }
  0xae   : > { %819 = vmatpush1.bf16.msra.mxu0 %v4275_v20 }
  0xaf   : > { %820 = vmatprep.subr.bf16.mxu0 %v4277_v22 }
  0xb0   : > { %3837 = vmatpush3.bf16.msra.mxu1 %v4286_v30  ;;  %v663_v30 = vld [vmem:[%s5488_s4] sm:$0x7] }
  0xb1   : > { %3838 = vmatprep.subr.bf16.mxu1 %v4287_v31 }
  0xb2   : > { %821 = vmatpush1.bf16.msra.mxu0 %v4279_v23 }
  0xb3   : > { %822 = vmatprep.subr.bf16.mxu0 %v4281_v25 }
  0xb4   : > { %3839 = vmatpush3.bf16.msra.mxu1 %v4287_v31 }
  0xb5   : > { %3840 = vmatprep.subr.bf16.mxu1 %v4288_v32 }
  0xb6   : > { %823 = vmatpush1.bf16.msra.mxu0 %v4283_v26 }
  0xb8   : > { %3841 = vmatpush3.bf16.msra.mxu1 %v4288_v32 }
 0x120   : > { %v553_v33 = vpop.xlane.xlu0 %552 }
 0x121   : > { %v561_v34 = vmul.f32 0.0078125, %v553_v33 }
 0x122   : > { %v570_v35 = vpop.xlane.xlu1 %569 }
 0x123   : > { %v581_v36 = vmul.f32 %v561_v34, %v561_v34  ;;  %v577_v37 = vmul.f32 0.0078125, %v570_v35  ;;  %v593_v3 = vsub.f32 %v5065_v0, %v561_v34 }
 0x124   : > { %v555_v38 = vpop.xlane.xlu0 %554 }
 0x125   : > { %v585_v39 = vsub.f32 %v577_v37, %v581_v36  ;;  %v562_v40 = vmul.f32 0.0078125, %v555_v38 }
 0x126   : > { %v572_v41 = vpop.xlane.xlu1 %571 }
 0x127   : > { %v589_v42 = vmax.f32 %v585_v39, 0.0  ;;  %v582_v43 = vmul.f32 %v562_v40, %v562_v40  ;;  %v578_v44 = vmul.f32 0.0078125, %v572_v41  ;;  %v594_v9 = vsub.f32 %v5068_v1, %v562_v40 }
 0x128   : > { %v557_v45 = vpop.xlane.xlu0 %556 }
 0x129   : > { %v597_v46 = vadd.f32 1e-05, %v589_v42  ;;  %v586_v47 = vsub.f32 %v578_v44, %v582_v43  ;;  %v563_v48 = vmul.f32 0.0078125, %v557_v45 }
 0x12a   : > { %v559_v49 = vpop.xlane.xlu1 %558 }
 0x12b   : > { %4361 = vrsqrt.f32 %v597_v46  ;;  %v590_v50 = vmax.f32 %v586_v47, 0.0  ;;  %v583_v51 = vmul.f32 %v563_v48, %v563_v48  ;;  %v564_v52 = vmul.f32 0.0078125, %v559_v49 }
 0x12c   : > { %v574_v53 = vpop.xlane.xlu0 %573  ;;  %v595_v14 = vsub.f32 %v5076_v4, %v563_v48  ;;  %v4787_v4 = vmov 0.0  }
 0x12d   : > { %v598_v54 = vadd.f32 1e-05, %v590_v50  ;;  %v579_v55 = vmul.f32 0.0078125, %v574_v53  ;;  %v584_v56 = vmul.f32 %v564_v52, %v564_v52  ;;  %v596_v16 = vsub.f32 %v5080_v5, %v564_v52  ;;  %3846 = vmatprep.subr.bf16.mxu1 %v4787_v4  ;;  %3852 = vmatprep.subr.bf16.mxu0 %v4787_v4 }
 0x12e   : > { %v576_v57 = vpop.xlane.xlu1 %575  ;;  %v665_v5 = vlaneseq }
 0x12f   : > { %4363 = vrsqrt.f32 %v598_v54  ;;  %v587_v58 = vsub.f32 %v579_v55, %v583_v51  ;;  %v580_v59 = vmul.f32 0.0078125, %v576_v57 }
 0x131   : > { %v591_v60 = vmax.f32 %v587_v58, 0.0  ;;  %v588_v61 = vsub.f32 %v580_v59, %v584_v56 }
 0x133   : > { %v599_v62 = vadd.f32 1e-05, %v591_v60  ;;  %v592_v63 = vmax.f32 %v588_v61, 0.0 }
 0x135   : > { %4365 = vrsqrt.f32 %v599_v62  ;;  %v600_v2 = vadd.f32 1e-05, %v592_v63 }
 0x137   : > { %4367 = vrsqrt.f32 %v600_v2 }
 0x138   : > { %v4362_v6 = vpop.eup %4361 }
 0x139   : > { %v605_v7 = vmul.f32 %v4362_v6, %v593_v3 }
 0x13b   : > { %v615_v12 = vmul.f32 %v3536_v8, %v605_v7 }
 0x13c   : > { %v4364_v10 = vpop.eup %4363 }
 0x13d   : > { %v606_v11 = vmul.f32 %v4364_v10, %v594_v9  ;;  %v625_v17 = vadd.f32 %v3537_v13, %v615_v12 }
 0x13f   : > { %v616_v15 = vmul.f32 %v3536_v8, %v606_v11 }
 0x141   : > { %v626_v18 = vadd.f32 %v3537_v13, %v616_v15 }
 0x142   : > { %v4366_v19 = vpop.eup %4365 }
 0x143   : > { %v629_v20 = vpack.c.bf16 %v626_v18, %v625_v17  ;;  %v607_v0 = vmul.f32 %v4366_v19, %v595_v14 }
 0x144   : > { %v4368_v21 = vpop.eup %4367 }
 0x145   : > { %841 = vmatmul.mubr.bf16.vlgmr.msra.gmra.mxu0 %v629_v20  ;;  %3842 = vmatprep.mubr.bf16.mxu1 %v629_v20  ;;  %v608_v22 = vmul.f32 %v4368_v21, %v596_v16  ;;  %v617_v23 = vmul.f32 %v3536_v8, %v607_v0 }
 0x146   : > { %850 = vmatprep.mubr.bf16.mxu0 %v4786_v27  ;;  %v666_v27 = vshrl.u32 %v665_v5, 7 }
 0x147   : > { %v618_v1 = vmul.f32 %v3536_v8, %v608_v22  ;;  %v627_v24 = vadd.f32 %v3537_v13, %v617_v23 }
 0x148   : > { %v671_v28 = vsub.s32 1, %v666_v27  ;;  %v5103_v31 = vsub.s32 0, %v666_v27  ;;  %v675_v35 = vsub.s32 2, %v666_v27 }
 0x149   : > { %v628_v25 = vadd.f32 %v3537_v13, %v618_v1 }
 0x14a   : > { %v672_v33 = vrot.slane %v663_v30, %v671_v28  ;;  %v668_v36 = vrot.slane %v663_v30, %v5103_v31  ;;  %v676_v44 = vrot.slane %v663_v30, %v675_v35 }
 0x14b   : > { %v630_v26 = vpack.c.bf16 %v628_v25, %v627_v24 }
 0x14d   : > { %851 = vmatmul.mubr.bf16.gmra.mxu0 %v630_v26  ;;  %3843 = vmatmul.mubr.bf16.vlgmr.msra.gmra.mxu1 %v630_v26 }
 0x14e   : > { %3848 = vmatprep.mubr.msk.bf16.mxu1 %vm4788_vm0, %v4787_v4  ;;  %3854 = vmatprep.mubr.msk.bf16.mxu0 %vm4788_vm0, %v4787_v4 }
 0x205   : > { %v842_v29 = vpop.f32.mrf.mxu0 }
 0x206   : > { %v843_v45 = vadd.f32 %v842_v29, %v668_v36 }
 0x207   : > { %v844_v32 = vpop.f32.mrf.mxu0 }
 0x208   : > { %v845_v38 = vadd.f32 %v844_v32, %v672_v33  ;;  %v910_v54 = vmul.f32 0.17677669, %v843_v45 }
 0x209   : > { %v846_v34 = vpop.f32.mrf.mxu0 }
 0x20a   : > { %v847_v42 = vadd.f32 %v846_v34, %v668_v36 }
 0x20b   : > { %v848_v37 = vpop.f32.mrf.mxu0 }
 0x20c   : > { %v849_v39 = vadd.f32 %v848_v37, %v672_v33  ;;  %v911_v51 = vmul.f32 0.17677669, %v847_v42 }
 0x20d   : > { %v852_v40 = vpop.f32.mrf.mxu0  ;;  %v3844_v41 = vpop.f32.mrf.mxu1 }
 0x20e   : > { %v5106_v43 = vpack.c.bf16 %v849_v39, %v845_v38  ;;  %v853_v57 = vadd.f32 %v852_v40, %v668_v36  ;;  %v5111_v61 = vpack.c.bf16 %v911_v51, %v910_v54  ;;  %v904_v7 = vadd.f32 %v3844_v41, %v676_v44 }
 0x20f   : > { %v854_v46 = vpop.f32.mrf.mxu0  ;;  %v895_v47 = vpop.f32.mrf.mxu1 }
 0x210   : > { %v925_v48 = vsel %vm920_vm1, %v5106_v43, 0  ;;  %v855_v52 = vadd.f32 %v854_v46, %v672_v33  ;;  %v896_v53 = vadd.f32 %v895_v47, %v676_v44  ;;  %v912_v2 = vmul.f32 0.17677669, %v853_v57 }
 0x211   : > { %v856_v49 = vpop.f32.mrf.mxu0  ;;  %3847 = vmatpush3.bf16.xpose.msra.mxu1 %v925_v48  ;;  %v3845_v50 = vpop.f32.mrf.mxu1 }
 0x212   : > { %3858 = vmatprep.subr.bf16.mxu1 %v4787_v4  ;;  %v857_v58 = vadd.f32 %v856_v49, %v668_v36  ;;  %v907_v8 = vadd.f32 %v3845_v50, %v676_v44 }
 0x213   : > { %v858_v55 = vpop.f32.mrf.mxu0  ;;  %v898_v56 = vpop.f32.mrf.mxu1 }
 0x214   : > { %v859_v59 = vadd.f32 %v858_v55, %v672_v33  ;;  %v899_v60 = vadd.f32 %v898_v56, %v676_v44  ;;  %v913_v3 = vmul.f32 0.17677669, %v857_v58  ;;  %v5128_v10 = vpack.c.bf16 %v907_v8, %v904_v7 }
 0x216   : > { %v5113_v62 = vpack.c.bf16 %v859_v59, %v855_v52  ;;  %v5115_v63 = vpack.c.bf16 %v899_v60, %v896_v53  ;;  %v5126_v9 = vpack.c.bf16 %v913_v3, %v912_v2 }
 0x218   : > { %3849 = vmatmul.mubr.msk.bf16.vlgmr.msra.gmra.mxu1 %vm920_vm1, %v5111_v61  ;;  %v972_v6 = vsel %vm920_vm1, %v5113_v62, 0 }
 0x219   : > { %3853 = vmatpush3.bf16.xpose.msra.mxu0 %v972_v6  ;;  %3859 = vmatpush3.bf16.msra.mxu1 %v5115_v63 }
 0x21a   : > { %3864 = vmatprep.subr.bf16.mxu0 %v4787_v4  ;;  %3860 = vmatprep.mubr.msk.bf16.mxu1 %vm4788_vm0, %v4787_v4 }
 0x21b   : > { %3870 = vmatprep.subr.bf16.mxu1 %v4787_v4 }
 0x220   : > { %3855 = vmatmul.mubr.msk.bf16.vlgmr.msra.gmra.mxu0 %vm920_vm1, %v5126_v9 }
 0x221   : > { %3865 = vmatpush3.bf16.msra.mxu0 %v5128_v10  ;;  %3866 = vmatprep.mubr.msk.bf16.mxu0 %vm4788_vm0, %v4787_v4 }
 0x222   : > { %3876 = vmatprep.subr.bf16.mxu0 %v4787_v4 }
 0x2d8   : > { %v961_v11 = vpop.f32.mrf.mxu1 }
 0x2d9   : > { %v1016_v12 = vsel %vm1015_vm2, %v961_v11, -inf }
 0x2da   : > { %1017 = vmax.xlane.f32.xlu0 %v1016_v12  ;;  %v3850_v13 = vpop.f32.mrf.mxu1 }
 0x2dc   : > { %v964_v14 = vpop.f32.mrf.mxu1 }
 0x2dd   : > { %v1019_v15 = vsel %vm1015_vm2, %v964_v14, -inf }
 0x2de   : > { %1020 = vmax.xlane.f32.xlu1 %v1019_v15  ;;  %v3851_v16 = vpop.f32.mrf.mxu1 }
 0x2e0   : > { %v1008_v17 = vpop.f32.mrf.mxu0 }
 0x2e1   : > { %v1022_v18 = vsel %vm1015_vm2, %v1008_v17, -inf }
 0x2e2   : > { %1023 = vmax.xlane.f32.xlu0 %v1022_v18  ;;  %v3856_v19 = vpop.f32.mrf.mxu0 }
 0x2e4   : > { %v1011_v20 = vpop.f32.mrf.mxu0 }
 0x2e5   : > { %v1025_v0 = vsel %vm1015_vm2, %v1011_v20, -inf }
 0x2e6   : > { %1026 = vmax.xlane.f32.xlu1 %v1025_v0  ;;  %v3857_v21 = vpop.f32.mrf.mxu0 }
 0x363   : > { %v1018_v22 = vpop.xlane.xlu0 %1017 }
 0x364   : > { %v1028_v23 = vsub.f32 %v961_v11, %v1018_v22 }
 0x366   : > { %v1032_v1 = vmul.f32 1.442695, %v1028_v23 }
 0x367   : > { %v1021_v24 = vpop.xlane.xlu1 %1020 }
 0x368   : > { %4369 = vpow2.f32 %v1032_v1  ;;  %v1029_v25 = vsub.f32 %v964_v14, %v1021_v24 }
 0x36a   : > { %v1034_v26 = vmul.f32 1.442695, %v1029_v25 }
 0x36b   : > { %v1024_v5 = vpop.xlane.xlu0 %1023 }
 0x36c   : > { %4371 = vpow2.f32 %v1034_v26  ;;  %v1030_v27 = vsub.f32 %v1008_v17, %v1024_v5 }
 0x36e   : > { %v1036_v28 = vmul.f32 1.442695, %v1030_v27 }
 0x36f   : > { %v1027_v36 = vpop.xlane.xlu1 %1026 }
 0x370   : > { %4373 = vpow2.f32 %v1036_v28  ;;  %v1031_v37 = vsub.f32 %v1011_v20, %v1027_v36 }
 0x372   : > { %v1038_v38 = vmul.f32 1.442695, %v1031_v37 }
 0x374   : > { %4375 = vpow2.f32 %v1038_v38 }
 0x375   : > { %v4370_v29 = vpop.eup %4369 }
 0x376   : > { %v1040_v30 = vsel %vm1015_vm2, %v4370_v29, 0.0 }
 0x377   : > { %1041 = vadd.xlane.f32.xlu0 %v1040_v30 }
 0x379   : > { %v4372_v32 = vpop.eup %4371 }
 0x37a   : > { %v1043_v33 = vsel %vm1015_vm2, %v4372_v32, 0.0 }
 0x37b   : > { %1044 = vadd.xlane.f32.xlu1 %v1043_v33 }
 0x37d   : > { %v4374_v34 = vpop.eup %4373 }
 0x37e   : > { %v1046_v35 = vsel %vm1015_vm2, %v4374_v34, 0.0 }
 0x37f   : > { %1047 = vadd.xlane.f32.xlu0 %v1046_v35 }
 0x381   : > { %v4376_v39 = vpop.eup %4375 }
 0x382   : > { %v1049_v40 = vsel %vm1015_vm2, %v4376_v39, 0.0 }
 0x38c   : > { %1213 = vrot.lane.b32.xlu1 %v5113_v62, %s4789_s9 }
 0x395   : > { %1160 = vrot.lane.b32.xlu0 %v5106_v43, %s4789_s9 }
 0x3b0   : > { %1050 = vadd.xlane.f32.xlu1 %v1049_v40 }
 0x3c1   : > { %1157 = vrot.lane.b32.xlu1 %v5111_v61, %s4789_s9 }
 0x3c5   : > { %1210 = vrot.lane.b32.xlu1 %v5126_v9, %s4789_s9 }
 0x400   : > { %v1042_v41 = vpop.xlane.xlu0 %1041 }
 0x401   : > { %4377 = vrcp.f32 %v1042_v41 }
 0x404   : > { %v1045_v42 = vpop.xlane.xlu1 %1044 }
 0x405   : > { %4379 = vrcp.f32 %v1045_v42 }
 0x408   : > { %v1048_v44 = vpop.xlane.xlu0 %1047  ;;  %v1214_v52 = vpop.permute.xlu1 %1213 }
 0x409   : > { %4381 = vrcp.f32 %v1048_v44  ;;  %v1219_v60 = vsel %vm920_vm1, %v1214_v52, 0 }
 0x40c   : > { %v1161_v49 = vpop.permute.xlu0 %1160 }
 0x40d   : > { %v1166_v51 = vsel %vm920_vm1, %v1161_v49, 0 }
 0x40e   : > { %v4378_v45 = vpop.eup %4377 }
 0x40f   : > { %v1056_v47 = vmul.f32 %v4378_v45, %v4370_v29 }
 0x412   : > { %v4380_v46 = vpop.eup %4379 }
 0x413   : > { %v1057_v48 = vmul.f32 %v4380_v46, %v4372_v32 }
 0x415   : > { %v1060_v50 = vpack.c.bf16 %v1057_v48, %v1056_v47 }
 0x416   : > { %v4382_v55 = vpop.eup %4381 }
 0x417   : > { %3861 = vmatmul.mubr.msk.bf16.vlgmr.msra.gmra.mxu1 %vm1015_vm2, %v1060_v50  ;;  %v1058_v57 = vmul.f32 %v4382_v55, %v4374_v34 }
 0x418   : > { %3871 = vmatpush3.bf16.xpose.msra.mxu1 %v1166_v51  ;;  %3872 = vmatprep.mubr.msk.bf16.mxu1 %vm4788_vm0, %v4787_v4 }
 0x419   : > { %3882 = vmatprep.subr.bf16.mxu1 %v4787_v4 }
 0x439   : > { %v1051_v53 = vpop.xlane.xlu1 %1050 }
 0x43a   : > { %4383 = vrcp.f32 %v1051_v53 }
 0x43d   : > { %v1158_v54 = vpop.permute.xlu1 %1157 }
 0x43e   : > { %3873 = vmatmul.mubr.msk.bf16.vlgmr.msra.gmra.mxu1 %vm920_vm1, %v1158_v54 }
 0x43f   : > { %3884 = vmatprep.mubr.msk.bf16.mxu1 %vm4788_vm0, %v4787_v4 }
 0x441   : > { %v1211_v2 = vpop.permute.xlu1 %1210 }
 0x447   : > { %v4384_v56 = vpop.eup %4383 }
 0x448   : > { %v1059_v58 = vmul.f32 %v4384_v56, %v4376_v39 }
 0x44a   : > { %v1061_v59 = vpack.c.bf16 %v1059_v58, %v1058_v57  ;;  %v4289_v58 = vld [vmem:[#allocation10 + $0x8] sm:$0xff]  }
 0x44c   : > { %3867 = vmatmul.mubr.msk.bf16.vlgmr.msra.gmra.mxu0 %vm1015_vm2, %v1061_v59 }
 0x44d   : > { %3877 = vmatpush3.bf16.xpose.msra.mxu0 %v1219_v60  ;;  %3878 = vmatprep.mubr.msk.bf16.mxu0 %vm4788_vm0, %v4787_v4 }
 0x44e   : > { %3888 = vmatprep.subr.bf16.mxu0 %v4787_v4 }
 0x454   : > { %3879 = vmatmul.mubr.msk.bf16.vlgmr.msra.gmra.mxu0 %vm920_vm1, %v1211_v2 }
 0x455   : > { %3890 = vmatprep.mubr.msk.bf16.mxu0 %vm4788_vm0, %v4787_v4 }
 0x4d7   : > { %v5168_v3 = vpop.f32.mrf.mxu1 }
 0x4d9   : > { %v3862_v6 = vpop.f32.mrf.mxu1 }
 0x4db   : > { %v5170_v7 = vpop.f32.mrf.mxu1 }
 0x4dc   : > { %v1150_v8 = vpack.c.bf16 %v5170_v7, %v5168_v3  ;;  %v4291_v7 = vld [vmem:[#allocation10 + $0x18] sm:$0xff]  }
 0x4dd   : > { %v3863_v11 = vpop.f32.mrf.mxu1 }
 0x4fe   : > { %v1202_v12 = vpop.f32.mrf.mxu1 }
 0x4ff   : > { %v1262_v13 = vsel %vm1015_vm2, %v1202_v12, -inf }
 0x500   : > { %1263 = vmax.xlane.f32.xlu0 %v1262_v13  ;;  %v3874_v14 = vpop.f32.mrf.mxu1  ;;  %v4290_v13 = vld [vmem:[#allocation10] sm:$0xff]  }
 0x502   : > { %v1205_v15 = vpop.f32.mrf.mxu1 }
 0x503   : > { %v1265_v16 = vsel %vm1015_vm2, %v1205_v15, -inf }
 0x504   : > { %1266 = vmax.xlane.f32.xlu1 %v1265_v16  ;;  %v3875_v17 = vpop.f32.mrf.mxu1 }
 0x50c   : > { %v5176_v18 = vpop.f32.mrf.mxu0 }
 0x50e   : > { %v3868_v19 = vpop.f32.mrf.mxu0 }
 0x510   : > { %v5178_v20 = vpop.f32.mrf.mxu0 }
 0x511   : > { %v1151_v0 = vpack.c.bf16 %v5178_v20, %v5176_v18 }
 0x512   : > { %v3869_v21 = vpop.f32.mrf.mxu0 }
 0x514   : > { %v1255_v22 = vpop.f32.mrf.mxu0 }
 0x515   : > { %v1268_v23 = vsel %vm1015_vm2, %v1255_v22, -inf }
 0x516   : > { %1269 = vmax.xlane.f32.xlu0 %v1268_v23  ;;  %v3880_v1 = vpop.f32.mrf.mxu0 }
 0x518   : > { %v1258_v24 = vpop.f32.mrf.mxu0 }
 0x519   : > { %v1271_v25 = vsel %vm1015_vm2, %v1258_v24, -inf }
 0x51a   : > { %1272 = vmax.xlane.f32.xlu0 %v1271_v25  ;;  %v3881_v26 = vpop.f32.mrf.mxu0 }
 0x589   : > { %v1264_v5 = vpop.xlane.xlu0 %1263 }
 0x58a   : > { %v1274_v27 = vsub.f32 %v1202_v12, %v1264_v5 }
 0x58c   : > { %v1278_v28 = vmul.f32 1.442695, %v1274_v27 }
 0x58d   : > { %v1267_v29 = vpop.xlane.xlu1 %1266 }
 0x58e   : > { %4385 = vpow2.f32 %v1278_v28  ;;  %v1275_v30 = vsub.f32 %v1205_v15, %v1267_v29 }
 0x590   : > { %v1280_v32 = vmul.f32 1.442695, %v1275_v30 }
 0x592   : > { %4387 = vpow2.f32 %v1280_v32 }
 0x59b   : > { %v4386_v33 = vpop.eup %4385 }
 0x59c   : > { %v1286_v34 = vsel %vm1015_vm2, %v4386_v33, 0.0 }
 0x59d   : > { %1287 = vadd.xlane.f32.xlu0 %v1286_v34 }
 0x59f   : > { %v4388_v35 = vpop.eup %4387  ;;  %v1270_v36 = vpop.xlane.xlu0 %1269 }
 0x5a0   : > { %v1276_v37 = vsub.f32 %v1255_v22, %v1270_v36  ;;  %v1289_v38 = vsel %vm1015_vm2, %v4388_v35, 0.0 }
 0x5a1   : > { %1290 = vadd.xlane.f32.xlu1 %v1289_v38 }
 0x5a2   : > { %v1282_v39 = vmul.f32 1.442695, %v1276_v37 }
 0x5a3   : > { %v1273_v40 = vpop.xlane.xlu0 %1272 }
 0x5a4   : > { %4389 = vpow2.f32 %v1282_v39  ;;  %v1277_v41 = vsub.f32 %v1258_v24, %v1273_v40 }
 0x5a6   : > { %v1284_v42 = vmul.f32 1.442695, %v1277_v41 }
 0x5a8   : > { %4391 = vpow2.f32 %v1284_v42 }
 0x5b1   : > { %v4390_v44 = vpop.eup %4389 }
 0x5b2   : > { %v1292_v45 = vsel %vm1015_vm2, %v4390_v44, 0.0 }
 0x5b3   : > { %1293 = vadd.xlane.f32.xlu0 %v1292_v45 }
 0x5b5   : > { %v4392_v46 = vpop.eup %4391 }
 0x5b6   : > { %v1295_v47 = vsel %vm1015_vm2, %v4392_v46, 0.0 }
 0x5b7   : > { %1296 = vadd.xlane.f32.xlu1 %v1295_v47 }
 0x5c8   : > { %1357 = vrot.lane.b32.xlu1 %v5128_v10, %s4789_s9 }
 0x5c9   : > { %1309 = vrot.lane.b32.xlu0 %v5115_v63, %s4789_s9  ;;  %s542_s9 = scalar_lea.vmem [#allocation14], %s3528_s30 }
 0x5cc   : > { %1546 = vrot.lane.b32.xlu1 %v5106_v43, %s4790_s15 }
 0x5cd   : > { %1544 = vrot.lane.b32.xlu0 %v5111_v61, %s4790_s15 }
 0x5d0   : > { %1597 = vrot.lane.b32.xlu1 %v5113_v62, %s4790_s15 }
 0x5d4   : > { %1595 = vrot.lane.b32.xlu1 %v5126_v9, %s4790_s15 }
 0x626   : > { %v1288_v49 = vpop.xlane.xlu0 %1287 }
 0x62a   : > { %v1291_v48 = vpop.xlane.xlu1 %1290 }
 0x62b   : > { %4393 = vrcp.f32 %v1291_v48 }
 0x62c   : > { %4395 = vrcp.f32 %v1288_v49 }
 0x638   : > { %v4394_v50 = vpop.eup %4393 }
 0x639   : > { %v4396_v52 = vpop.eup %4395  ;;  %v1303_v53 = vmul.f32 %v4394_v50, %v4388_v35 }
 0x63a   : > { %v1302_v56 = vmul.f32 %v4396_v52, %v4386_v33 }
 0x63c   : > { %v1294_v51 = vpop.xlane.xlu0 %1293  ;;  %v1306_v57 = vpack.c.bf16 %v1303_v53, %v1302_v56 }
 0x63d   : > { %4397 = vrcp.f32 %v1294_v51 }
 0x640   : > { %v1297_v54 = vpop.xlane.xlu1 %1296  ;;  %v1310_v55 = vpop.permute.xlu0 %1309 }
 0x641   : > { %4399 = vrcp.f32 %v1297_v54  ;;  %3883 = vmatpush3.bf16.msra.mxu1 %v1310_v55 }
 0x642   : > { %3894 = vmatprep.subr.bf16.mxu1 %v4291_v7 }
 0x644   : > { %v1358_v59 = vpop.permute.xlu1 %1357  ;;  %3885 = vmatmul.mubr.msk.bf16.vlgmr.msra.gmra.mxu1 %vm1015_vm2, %v1306_v57  ;;  %v1545_v28 = vpop.permute.xlu0 %1544 }
 0x645   : > { %3889 = vmatpush3.bf16.msra.mxu0 %v1358_v59  ;;  %3895 = vmatpush3.bf16.msra.mxu1 %v4291_v7 }
 0x646   : > { %3902 = vmatprep.subr.bf16.mxu0 %v4289_v58 }
 0x648   : > { %v1547_v14 = vpop.permute.xlu1 %1546 }
 0x649   : > { %v1552_v25 = vsel %vm920_vm1, %v1547_v14, 0 }
 0x64a   : > { %v4398_v60 = vpop.eup %4397 }
 0x64b   : > { %v1304_v6 = vmul.f32 %v4398_v60, %v4390_v44 }
 0x64c   : > { %v1598_v15 = vpop.permute.xlu1 %1597 }
 0x64d   : > { %v1603_v16 = vsel %vm920_vm1, %v1598_v15, 0 }
 0x64e   : > { %v4400_v2 = vpop.eup %4399 }
 0x64f   : > { %v1305_v11 = vmul.f32 %v4400_v2, %v4392_v46 }
 0x650   : > { %v1596_v3 = vpop.permute.xlu1 %1595 }
 0x651   : > { %v1307_v12 = vpack.c.bf16 %v1305_v11, %v1304_v6 }
 0x653   : > { %3891 = vmatmul.mubr.msk.bf16.vlgmr.msra.gmra.mxu0 %vm1015_vm2, %v1307_v12 }
 0x654   : > { %3903 = vmatpush3.bf16.msra.mxu0 %v4289_v58  ;;  %3906 = vmatprep.mubr.msk.bf16.mxu0 %vm920_vm1, %v1150_v8  ;;  %v4292_v8 = vld [vmem:[#allocation10 + $0x10] sm:$0xff]  }
 0x655   : > { %3904 = vmatprep.subr.bf16.mxu0 %v4290_v13  ;;  %3896 = vmatprep.subr.bf16.mxu1 %v4292_v8 }
 0x656   : > { %3897 = vmatpush3.bf16.msra.mxu1 %v4292_v8 }
 0x657   : > { %3910 = vmatprep.subr.bf16.mxu1 %v4787_v4 }
 0x658   : > { %3905 = vmatpush3.bf16.msra.mxu0 %v4290_v13 }
 0x659   : > { %3916 = vmatprep.subr.bf16.mxu0 %v4787_v4 }
 0x65b   : > { %3907 = vmatmul.mubr.msk.bf16.vlgmr.msra.gmra.mxu0 %vm920_vm1, %v1151_v0 }
 0x65c   : > { %3917 = vmatpush3.bf16.xpose.msra.mxu0 %v1603_v16  ;;  %3918 = vmatprep.mubr.msk.bf16.mxu0 %vm4788_vm0, %v4787_v4 }
 0x65d   : > { %3928 = vmatprep.subr.bf16.mxu0 %v4787_v4 }
 0x663   : > { %3919 = vmatmul.mubr.msk.bf16.vlgmr.msra.gmra.mxu0 %vm920_vm1, %v1596_v3 }
 0x664   : > { %3930 = vmatprep.mubr.msk.bf16.mxu0 %vm4788_vm0, %v4787_v4 }
 0x704   : > { %v1349_v17 = vpop.f32.mrf.mxu1 }
 0x706   : > { %v3886_v18 = vpop.f32.mrf.mxu1 }
 0x708   : > { %v1352_v19 = vpop.f32.mrf.mxu1 }
 0x709   : > { %v1404_v20 = vpack.c.bf16 %v1352_v19, %v1349_v17 }
 0x70a   : > { %v3887_v0 = vpop.f32.mrf.mxu1 }
 0x70b   : > { %3898 = vmatprep.mubr.msk.bf16.mxu1 %vm920_vm1, %v1404_v20 }
 0x713   : > { %v1397_v21 = vpop.f32.mrf.mxu0 }
 0x715   : > { %v3892_v22 = vpop.f32.mrf.mxu0 }
 0x717   : > { %v1400_v23 = vpop.f32.mrf.mxu0 }
 0x718   : > { %v1405_v1 = vpack.c.bf16 %v1400_v23, %v1397_v21 }
 0x719   : > { %v3893_v24 = vpop.f32.mrf.mxu0 }
 0x71a   : > { %3899 = vmatmul.mubr.msk.bf16.vlgmr.msra.gmra.mxu1 %vm920_vm1, %v1405_v1 }
 0x71b   : > { %3911 = vmatpush3.bf16.xpose.msra.mxu1 %v1552_v25  ;;  %v5222_v26 = vpop.f32.mrf.mxu0  ;;  %3912 = vmatprep.mubr.msk.bf16.mxu1 %vm4788_vm0, %v4787_v4 }
 0x71c   : > { %3922 = vmatprep.subr.bf16.mxu1 %v4787_v4 }
 0x71d   : > { %v5227_v5 = vpop.f32.mrf.mxu0 }
 0x71f   : > { %v5229_v27 = vpop.f32.mrf.mxu0 }
 0x721   : > { %v5231_v29 = vpop.f32.mrf.mxu0 }
 0x722   : > { %3913 = vmatmul.mubr.msk.bf16.vlgmr.msra.gmra.mxu1 %vm920_vm1, %v1545_v28  ;;  %v4293_v28 = vld [vmem:[#allocation10 + $0x28] sm:$0xff]  }
 0x723   : > { %v1639_v30 = vpop.f32.mrf.mxu0  ;;  %3924 = vmatprep.mubr.msk.bf16.mxu1 %vm4788_vm0, %v4787_v4 }
 0x724   : > { %v1652_v45 = vsel %vm1015_vm2, %v1639_v30, -inf }
 0x725   : > { %v3920_v32 = vpop.f32.mrf.mxu0 }
 0x727   : > { %v1642_v33 = vpop.f32.mrf.mxu0 }
 0x728   : > { %v1655_v47 = vsel %vm1015_vm2, %v1642_v33, -inf }
 0x729   : > { %v3921_v34 = vpop.f32.mrf.mxu0 }
 0x7da   : > { %v5236_v35 = vpop.f32.mrf.mxu1 }
 0x7dc   : > { %v5238_v36 = vpop.f32.mrf.mxu1 }
 0x7de   : > { %v5240_v37 = vpop.f32.mrf.mxu1 }
 0x7e0   : > { %v5242_v38 = vpop.f32.mrf.mxu1 }
 0x7e2   : > { %v1588_v39 = vpop.f32.mrf.mxu1 }
 0x7e3   : > { %v1646_v40 = vsel %vm1015_vm2, %v1588_v39, -inf }
 0x7e4   : > { %1647 = vmax.xlane.f32.xlu0 %v1646_v40  ;;  %v3914_v41 = vpop.f32.mrf.mxu1 }
 0x7e6   : > { %v1591_v42 = vpop.f32.mrf.mxu1 }
 0x7e7   : > { %v1649_v44 = vsel %vm1015_vm2, %v1591_v42, -inf }
 0x7e8   : > { %1650 = vmax.xlane.f32.xlu1 %v1649_v44  ;;  %v3915_v46 = vpop.f32.mrf.mxu1  ;;  %1653 = vmax.xlane.f32.xlu0 %v1652_v45 }
 0x7ec   : > { %1656 = vmax.xlane.f32.xlu0 %v1655_v47 }
 0x86d   : > { %v1648_v48 = vpop.xlane.xlu0 %1647 }
 0x86e   : > { %v1658_v49 = vsub.f32 %v1588_v39, %v1648_v48 }
 0x870   : > { %v1662_v55 = vmul.f32 1.442695, %v1658_v49 }
 0x871   : > { %v1651_v50 = vpop.xlane.xlu1 %1650  ;;  %v1654_v51 = vpop.xlane.xlu0 %1653 }
 0x872   : > { %v1660_v52 = vsub.f32 %v1639_v30, %v1654_v51  ;;  %v1659_v53 = vsub.f32 %v1591_v42, %v1651_v50  ;;  %v4294_v30 = vld [vmem:[#allocation10 + $0x20] sm:$0xff]  }
 0x874   : > { %v1666_v54 = vmul.f32 1.442695, %v1660_v52  ;;  %v1664_v58 = vmul.f32 1.442695, %v1659_v53 }
 0x875   : > { %v1657_v56 = vpop.xlane.xlu0 %1656 }
 0x876   : > { %v1661_v57 = vsub.f32 %v1642_v33, %v1657_v56  ;;  %4401 = vpow2.f32 %v1666_v54 }
 0x877   : > { %4403 = vpow2.f32 %v1662_v55 }
 0x878   : > { %v1668_v59 = vmul.f32 1.442695, %v1661_v57 }
 0x87a   : > { %4405 = vpow2.f32 %v1668_v59 }
 0x87b   : > { %4407 = vpow2.f32 %v1664_v58 }
 0x883   : > { %v4402_v60 = vpop.eup %4401 }
 0x884   : > { %v1676_v2 = vsel %vm1015_vm2, %v4402_v60, 0.0  ;;  %v4404_v6 = vpop.eup %4403 }
 0x885   : > { %1677 = vadd.xlane.f32.xlu0 %v1676_v2  ;;  %v1670_v14 = vsel %vm1015_vm2, %v4404_v6, 0.0 }
 0x887   : > { %v4406_v11 = vpop.eup %4405 }
 0x888   : > { %v1679_v12 = vsel %vm1015_vm2, %v4406_v11, 0.0  ;;  %v4408_v13 = vpop.eup %4407 }
 0x889   : > { %1680 = vadd.xlane.f32.xlu1 %v1679_v12  ;;  %1671 = vadd.xlane.f32.xlu0 %v1670_v14  ;;  %v1673_v15 = vsel %vm1015_vm2, %v4408_v13, 0.0  ;;  %v1538_v12 = vadd.f32 %v5222_v26, %v5236_v35  ;;  %v1530_v14 = vadd.f32 %v5227_v5, %v5238_v36 }
 0x88d   : > { %1674 = vadd.xlane.f32.xlu1 %v1673_v15 }
 0x89e   : > { %1739 = vrot.lane.b32.xlu1 %v5128_v10, %s4790_s15 }
 0x89f   : > { %1692 = vrot.lane.b32.xlu0 %v5115_v63, %s4790_s15  ;;  %s3384_s15 = sshll.u32 %s542_s9, 4  ;;  %s5435_s15 = int_to_ptr.vmem [resolvable:$true] %s3384_s15 }
 0x8a0   : > { %s4693_s1 = scalar_lea.vmem %s5435_s15, 512 }
 0x8a1   : > { %p4694_p12 = scmp.ne.s32.totalorder %s5435_s15, %s4693_s1 }
 0x8a2   : > { %1865 = vrot.lane.b32.xlu1 %v5106_v43, %s4791_s3 }
 0x8a3   : > { %1863 = vrot.lane.b32.xlu0 %v5111_v61, %s4791_s3  ;;  %p4695_p0 = pnand %p4694_p12, %p5532_p13 }
 0x8a5   : > { %p4696_p2 = pneg %p4695_p0 }
 0x8a6   : > { %1916 = vrot.lane.b32.xlu1 %v5113_v62, %s4791_s3 }
 0x8aa   : > { %1914 = vrot.lane.b32.xlu1 %v5126_v9, %s4791_s3 }
 0x90e   : > { %v1678_v16 = vpop.xlane.xlu0 %1677 }
 0x90f   : > { %4409 = vrcp.f32 %v1678_v16  ;;  %v1541_v16 = vadd.f32 %v5229_v27, %v5240_v37 }
 0x912   : > { %v1681_v3 = vpop.xlane.xlu1 %1680  ;;  %v1672_v7 = vpop.xlane.xlu0 %1671 }
 0x913   : > { %4411 = vrcp.f32 %v1681_v3 }
 0x914   : > { %4413 = vrcp.f32 %v1672_v7 }
 0x916   : > { %v1675_v8 = vpop.xlane.xlu1 %1674  ;;  %v1693_v17 = vpop.permute.xlu0 %1692 }
 0x917   : > { %4415 = vrcp.f32 %v1675_v8  ;;  %3923 = vmatpush3.bf16.msra.mxu1 %v1693_v17  ;;  %v1533_v8 = vadd.f32 %v5231_v29, %v5242_v38 }
 0x918   : > { %3934 = vmatprep.subr.bf16.mxu1 %v4293_v28 }
 0x91a   : > { %v1740_v43 = vpop.permute.xlu1 %1739  ;;  %v1864_v25 = vpop.permute.xlu0 %1863 }
 0x91b   : > { %3929 = vmatpush3.bf16.msra.mxu0 %v1740_v43 }
 0x91c   : > { %3942 = vmatprep.subr.bf16.mxu0 %v4787_v4  ;;  %v4410_v61 = vpop.eup %4409 }
 0x91d   : > { %v1688_v62 = vmul.f32 %v4410_v61, %v4402_v60 }
 0x91e   : > { %v1866_v9 = vpop.permute.xlu1 %1865 }
 0x91f   : > { %v1871_v22 = vsel %vm920_vm1, %v1866_v9, 0 }
 0x920   : > { %v4412_v18 = vpop.eup %4411 }
 0x921   : > { %v1689_v19 = vmul.f32 %v4412_v18, %v4406_v11  ;;  %v4414_v20 = vpop.eup %4413 }
 0x922   : > { %v1686_v23 = vmul.f32 %v4414_v20, %v4404_v6  ;;  %v1917_v45 = vpop.permute.xlu1 %1916 }
 0x923   : > { %v1691_v0 = vpack.c.bf16 %v1689_v19, %v1688_v62  ;;  %v1922_v51 = vsel %vm920_vm1, %v1917_v45, 0 }
 0x924   : > { %v4416_v21 = vpop.eup %4415 }
 0x925   : > { %3931 = vmatmul.mubr.msk.bf16.vlgmr.msra.gmra.mxu0 %vm1015_vm2, %v1691_v0  ;;  %v1687_v1 = vmul.f32 %v4416_v21, %v4408_v13 }
 0x926   : > { %3943 = vmatpush3.bf16.xpose.msra.mxu0 %v1871_v22  ;;  %3944 = vmatprep.mubr.msk.bf16.mxu0 %vm4788_vm0, %v4787_v4  ;;  %v1915_v55 = vpop.permute.xlu1 %1914 }
 0x927   : > { %v1690_v24 = vpack.c.bf16 %v1687_v1, %v1686_v23  ;;  %3954 = vmatprep.subr.bf16.mxu0 %v4787_v4 }
 0x929   : > { %3925 = vmatmul.mubr.msk.bf16.vlgmr.msra.gmra.mxu1 %vm1015_vm2, %v1690_v24 }
 0x92a   : > { %3935 = vmatpush3.bf16.msra.mxu1 %v4293_v28 }
 0x92b   : > { %3936 = vmatprep.subr.bf16.mxu1 %v4294_v30 }
 0x92d   : > { %3945 = vmatmul.mubr.msk.bf16.vlgmr.msra.gmra.mxu0 %vm920_vm1, %v1864_v25 }
 0x92e   : > { %3956 = vmatprep.mubr.msk.bf16.mxu0 %vm4788_vm0, %v4787_v4  ;;  %3937 = vmatpush3.bf16.msra.mxu1 %v4294_v30 }
 0x92f   : > { %3948 = vmatprep.subr.bf16.mxu1 %v4787_v4 }
 0x9e5   : > { %v1779_v32 = vpop.f32.mrf.mxu0 }
 0x9e7   : > { %v3932_v33 = vpop.f32.mrf.mxu0 }
 0x9e9   : > { %v1732_v34 = vpop.f32.mrf.mxu1  ;;  %v1782_v39 = vpop.f32.mrf.mxu0 }
 0x9ea   : > { %v1787_v48 = vpack.c.bf16 %v1782_v39, %v1779_v32 }
 0x9eb   : > { %v3926_v40 = vpop.f32.mrf.mxu1  ;;  %v3933_v41 = vpop.f32.mrf.mxu0 }
 0x9ed   : > { %v1735_v42 = vpop.f32.mrf.mxu1  ;;  %v1907_v44 = vpop.f32.mrf.mxu0 }
 0x9ee   : > { %v1786_v46 = vpack.c.bf16 %v1735_v42, %v1732_v34  ;;  %v1965_v47 = vsel %vm1015_vm2, %v1907_v44, -inf }
 0x9ef   : > { %v3927_v49 = vpop.f32.mrf.mxu1  ;;  %1966 = vmax.xlane.f32.xlu0 %v1965_v47  ;;  %v3946_v50 = vpop.f32.mrf.mxu0  ;;  %v4295_v47 = vld [vmem:[#allocation10 + $0x38] sm:$0xff]  }
 0x9f0   : > { %3938 = vmatprep.mubr.msk.bf16.mxu1 %vm920_vm1, %v1786_v46 }
 0x9f1   : > { %3939 = vmatmul.mubr.msk.bf16.vlgmr.msra.gmra.mxu1 %vm920_vm1, %v1787_v48  ;;  %v1910_v52 = vpop.f32.mrf.mxu0  ;;  %v4296_v48 = vld [vmem:[#allocation10 + $0x30] sm:$0xff]  }
 0x9f2   : > { %3949 = vmatpush3.bf16.xpose.msra.mxu1 %v1922_v51  ;;  %v1968_v53 = vsel %vm1015_vm2, %v1910_v52, -inf  ;;  %3950 = vmatprep.mubr.msk.bf16.mxu1 %vm4788_vm0, %v4787_v4 }
 0x9f3   : > { %1969 = vmax.xlane.f32.xlu1 %v1968_v53  ;;  %v3947_v54 = vpop.f32.mrf.mxu0  ;;  %3960 = vmatprep.subr.bf16.mxu1 %v4787_v4 }
 0x9f9   : > { %3951 = vmatmul.mubr.msk.bf16.vlgmr.msra.gmra.mxu1 %vm920_vm1, %v1915_v55 }
 0x9fa   : > { %3962 = vmatprep.mubr.msk.bf16.mxu1 %vm4788_vm0, %v4787_v4 }
 0xa78   : > { %v1967_v2 = vpop.xlane.xlu0 %1966 }
 0xa79   : > { %v1977_v6 = vsub.f32 %v1907_v44, %v1967_v2  ;;  %v3594_v2 = vld [vmem:[%s5490_s6] ss:$0 sm:$0xff] }
 0xa7b   : > { %v1981_v11 = vmul.f32 1.442695, %v1977_v6 }
 0xa7c   : > { %v1970_v56 = vpop.xlane.xlu1 %1969 }
 0xa7d   : > { %v1978_v57 = vsub.f32 %v1910_v52, %v1970_v56 }
 0xa7f   : > { %v1983_v58 = vmul.f32 1.442695, %v1978_v57 }
 0xa81   : > { %4417 = vpow2.f32 %v1983_v58 }
 0xa82   : > { %4419 = vpow2.f32 %v1981_v11  ;;  %v4505_v11 = vld [vmem:[%s5046_s21 + $0x10] sm:$0xff] }
 0xa8e   : > { %v4418_v59 = vpop.eup %4417 }
 0xa8f   : > { %v1992_v60 = vsel %vm1015_vm2, %v4418_v59, 0.0  ;;  %v4420_v27 = vpop.eup %4419 }
 0xa90   : > { %1993 = vadd.xlane.f32.xlu1 %v1992_v60  ;;  %v1989_v62 = vsel %vm1015_vm2, %v4420_v27, 0.0 }
 0xab1   : > { %v3940_v13 = vpop.f32.mrf.mxu1 }
 0xab2   : > { %v5291_v4 = vadd.f32 %v3940_v13, %v1538_v12 }
 0xab3   : > { %v1844_v15 = vpop.f32.mrf.mxu1 }
 0xab4   : > { %v5295_v3 = vadd.f32 %v1844_v15, %v1530_v14 }
 0xab5   : > { %v3941_v7 = vpop.f32.mrf.mxu1 }
 0xab6   : > { %v5299_v17 = vadd.f32 %v3941_v7, %v1541_v16  ;;  %v4506_v16 = vld [vmem:[%s5046_s21] sm:$0xff] }
 0xab7   : > { %v1847_v26 = vpop.f32.mrf.mxu1 }
 0xab8   : > { %v5301_v35 = vadd.f32 %v1847_v26, %v1533_v8 }
 0xab9   : > { %v1958_v43 = vpop.f32.mrf.mxu1 }
 0xaba   : > { %v1971_v5 = vsel %vm1015_vm2, %v1958_v43, -inf }
 0xabb   : > { %v3952_v36 = vpop.f32.mrf.mxu1  ;;  %1972 = vmax.xlane.f32.xlu0 %v1971_v5 }
 0xabd   : > { %v1961_v61 = vpop.f32.mrf.mxu1 }
 0xabe   : > { %v1974_v18 = vsel %vm1015_vm2, %v1961_v61, -inf }
 0xabf   : > { %v3953_v37 = vpop.f32.mrf.mxu1  ;;  %1975 = vmax.xlane.f32.xlu0 %v1974_v18 }
 0xac3   : > { %1990 = vadd.xlane.f32.xlu0 %v1989_v62 }
 0xb19   : > { %v1994_v25 = vpop.xlane.xlu1 %1993 }
 0xb44   : > { %v1973_v29 = vpop.xlane.xlu0 %1972 }
 0xb45   : > { %v1979_v38 = vsub.f32 %v1958_v43, %v1973_v29  ;;  %v4297_v29 = vld [vmem:[#allocation11 + $0xe0] ss:$16 sps:$4 sm:$0xff]  }
 0xb47   : > { %v1985_v19 = vmul.f32 1.442695, %v1979_v38  ;;  %v4298_v38 = vld [vmem:[#allocation11 + $0xe4] ss:$16 sps:$4 sm:$0xff]  }
 0xb48   : > { %v1976_v20 = vpop.xlane.xlu0 %1975 }
 0xb49   : > { %4421 = vpow2.f32 %v1985_v19  ;;  %v1980_v9 = vsub.f32 %v1961_v61, %v1976_v20  ;;  %v4508_v61 = vld [vmem:[%s5046_s21 + $0x8] sm:$0xff]  ;;  %v4299_v19 = vld [vmem:[#allocation11 + $0xc0] ss:$16 sps:$4 sm:$0xff]  }
 0xb4a   : > { %v4300_v20 = vld [vmem:[#allocation11 + $0xc4] ss:$16 sps:$4 sm:$0xff]  }
 0xb4b   : > { %v1987_v0 = vmul.f32 1.442695, %v1980_v9  ;;  %v4301_v9 = vld [vmem:[#allocation11 + $0xa0] ss:$16 sps:$4 sm:$0xff]  }
 0xb4c   : > { %v1991_v24 = vpop.xlane.xlu0 %1990 }
 0xb4d   : > { %4423 = vpow2.f32 %v1987_v0  ;;  %v4302_v0 = vld [vmem:[#allocation11 + $0xa4] ss:$16 sps:$4 sm:$0xff]  }
 0xb4e   : > { %4425 = vrcp.f32 %v1991_v24  ;;  %v4307_v24 = vld [vmem:[#allocation11 + $0x40] ss:$16 sps:$4 sm:$0xff]  }
 0xb4f   : > { %4427 = vrcp.f32 %v1994_v25  ;;  %v4308_v25 = vld [vmem:[#allocation11 + $0x44] ss:$16 sps:$4 sm:$0xff]  }
 0xb56   : > { %v4422_v21 = vpop.eup %4421 }
 0xb57   : > { %v1995_v22 = vsel %vm1015_vm2, %v4422_v21, 0.0 }
 0xb58   : > { %1996 = vadd.xlane.f32.xlu0 %v1995_v22  ;;  %v4304_v22 = vld [vmem:[#allocation11 + $0x84] ss:$16 sps:$4 sm:$0xff]  }
 0xb5a   : > { %v4424_v23 = vpop.eup %4423 }
 0xb5b   : > { %v1998_v1 = vsel %vm1015_vm2, %v4424_v23, 0.0  ;;  %v4426_v28 = vpop.eup %4425 }
 0xb5c   : > { %1999 = vadd.xlane.f32.xlu1 %v1998_v1  ;;  %v4428_v32 = vpop.eup %4427  ;;  %v2005_v33 = vmul.f32 %v4426_v28, %v4420_v27  ;;  %v4306_v1 = vld [vmem:[#allocation11 + $0x64] ss:$16 sps:$4 sm:$0xff]   ;;  %v4309_v28 = vld [vmem:[#allocation11 + $0x20] ss:$16 sps:$4 sm:$0xff]  }
 0xb5d   : > { %v2006_v40 = vmul.f32 %v4428_v32, %v4418_v59  ;;  %v4311_v32 = vld [vmem:[#allocation11] ss:$16 sps:$4 sm:$0xff]  }
 0xb5f   : > { %v2009_v41 = vpack.c.bf16 %v2006_v40, %v2005_v33  ;;  %v4312_v33 = vld [vmem:[#allocation11 + $0x4] ss:$16 sps:$4 sm:$0xff]  }
 0xb6d   : > { %2058 = vrot.lane.b32.xlu1 %v5128_v10, %s4791_s3 }
 0xb6e   : > { %2011 = vrot.lane.b32.xlu0 %v5115_v63, %s4791_s3  ;;  %s3687_s3 = sshll.u32 %s4886_s14, 9  ;;  %s4792_s14 = smov [#allocation14]  }
 0xb6f   : > { %s5441_s17 = scalar_lea.hbm %s5497_s13, %s3687_s3  ;;  %s4697_s11 = sshll.u32 %s4792_s14, 4  ;;  %s4698_s11 = int_to_ptr.vmem [resolvable:$false] %s4697_s11 }
 0xb70   : > { %s4699_s20 = scalar_lea.vmem %s4698_s11, 1024  ;;  %p4700_p5 = scmp.lt.s32.totalorder %s5435_s15, %s4698_s11 }
 0xb71   : > { %p4701_p8 = scmp.lt.s32.totalorder %s4699_s20, %s4693_s1 }
 0xb73   : > { %p4702_p7 = por %p4701_p8, %p4700_p5 }
 0xb75   : > { %p4703_p6 = pnand %p4702_p7, %p4696_p2 }
 0xbe1   : > { %v1997_v30 = vpop.xlane.xlu0 %1996 }
 0xbe2   : > { %4429 = vrcp.f32 %v1997_v30  ;;  %v4310_v30 = vld [vmem:[#allocation11 + $0x24] ss:$16 sps:$4 sm:$0xff]  }
 0xbe5   : > { %v2012_v34 = vpop.permute.xlu0 %2011  ;;  %v2000_v39 = vpop.xlane.xlu1 %1999 }
 0xbe6   : > { %4431 = vrcp.f32 %v2000_v39  ;;  %3955 = vmatpush3.bf16.msra.mxu0 %v2012_v34 }
 0xbe7   : > { %3966 = vmatprep.subr.bf16.mxu0 %v4295_v47 }
 0xbe9   : > { %3957 = vmatmul.mubr.msk.bf16.vlgmr.msra.gmra.mxu0 %vm1015_vm2, %v2009_v41  ;;  %v2059_v10 = vpop.permute.xlu1 %2058 }
 0xbea   : > { %3961 = vmatpush3.bf16.msra.mxu1 %v2059_v10  ;;  %3967 = vmatpush3.bf16.msra.mxu0 %v4295_v47 }
 0xbeb   : > { %3968 = vmatprep.subr.bf16.mxu0 %v4296_v48  ;;  %3974 = vmatprep.subr.bf16.mxu1 %v4297_v29 }
 0xbee   : > { %3969 = vmatpush3.bf16.msra.mxu0 %v4296_v48 }
 0xbef   : > { %v4430_v63 = vpop.eup %4429  ;;  %3994 = vmatprep.subr.bf16.mxu0 %v4298_v38 }
 0xbf0   : > { %v2007_v44 = vmul.f32 %v4430_v63, %v4422_v21  ;;  %v4303_v21 = vld [vmem:[#allocation11 + $0x80] ss:$16 sps:$4 sm:$0xff]  }
 0xbf3   : > { %v4432_v42 = vpop.eup %4431 }
 0xbf4   : > { %v2008_v45 = vmul.f32 %v4432_v42, %v4424_v23  ;;  %v4305_v23 = vld [vmem:[#allocation11 + $0x60] ss:$16 sps:$4 sm:$0xff]  }
 0xbf6   : > { %v2010_v46 = vpack.c.bf16 %v2008_v45, %v2007_v44 }
 0xbf8   : > { %3963 = vmatmul.mubr.msk.bf16.vlgmr.msra.gmra.mxu1 %vm1015_vm2, %v2010_v46 }
 0xbf9   : > { %3975 = vmatpush3.bf16.msra.mxu1 %v4297_v29 }
 0xbfa   : > { %3976 = vmatprep.subr.bf16.mxu1 %v4299_v19 }
 0xbfd   : > { %3977 = vmatpush3.bf16.msra.mxu1 %v4299_v19 }
 0xbfe   : > { %3978 = vmatprep.subr.bf16.mxu1 %v4301_v9 }
 0xc01   : > { %3979 = vmatpush3.bf16.msra.mxu1 %v4301_v9 }
 0xc02   : > { %3980 = vmatprep.subr.bf16.mxu1 %v4303_v21 }
 0xc05   : > { %3981 = vmatpush3.bf16.msra.mxu1 %v4303_v21 }
 0xc06   : > { %3982 = vmatprep.subr.bf16.mxu1 %v4305_v23 }
 0xc09   : > { %3983 = vmatpush3.bf16.msra.mxu1 %v4305_v23 }
 0xc0a   : > { %3984 = vmatprep.subr.bf16.mxu1 %v4307_v24 }
 0xc0d   : > { %3985 = vmatpush3.bf16.msra.mxu1 %v4307_v24 }
 0xc0e   : > { %3986 = vmatprep.subr.bf16.mxu1 %v4309_v28 }
 0xc11   : > { %3987 = vmatpush3.bf16.msra.mxu1 %v4309_v28 }
 0xc12   : > { %3988 = vmatprep.subr.bf16.mxu1 %v4311_v32 }
 0xc15   : > { %3989 = vmatpush3.bf16.msra.mxu1 %v4311_v32  ;;  %v4314_v32 = vld [vmem:[#allocation13 + $0x38] sm:$0xff]  }
 0xca9   : > { %v2051_v49 = vpop.f32.mrf.mxu0 }
 0xcab   : > { %v3958_v50 = vpop.f32.mrf.mxu0 }
 0xcad   : > { %v2054_v51 = vpop.f32.mrf.mxu0 }
 0xcae   : > { %v2105_v52 = vpack.c.bf16 %v2054_v51, %v2051_v49 }
 0xcaf   : > { %v3959_v53 = vpop.f32.mrf.mxu0 }
 0xcb0   : > { %3970 = vmatprep.mubr.msk.bf16.mxu0 %vm920_vm1, %v2105_v52 }
 0xcb8   : > { %v2098_v54 = vpop.f32.mrf.mxu1 }
 0xcba   : > { %v3964_v55 = vpop.f32.mrf.mxu1 }
 0xcbc   : > { %v2101_v56 = vpop.f32.mrf.mxu1 }
 0xcbd   : > { %v2106_v57 = vpack.c.bf16 %v2101_v56, %v2098_v54 }
 0xcbe   : > { %v3965_v58 = vpop.f32.mrf.mxu1 }
 0xcbf   : > { %3971 = vmatmul.mubr.msk.bf16.vlgmr.msra.gmra.mxu0 %vm920_vm1, %v2106_v57 }
 0xcc0   : > { %3995 = vmatpush3.bf16.msra.mxu0 %v4298_v38 }
 0xcc1   : > { %3996 = vmatprep.subr.bf16.mxu0 %v4300_v20 }
 0xcc4   : > { %3997 = vmatpush3.bf16.msra.mxu0 %v4300_v20 }
 0xcc5   : > { %3998 = vmatprep.subr.bf16.mxu0 %v4302_v0 }
 0xcc8   : > { %3999 = vmatpush3.bf16.msra.mxu0 %v4302_v0 }
 0xcc9   : > { %4000 = vmatprep.subr.bf16.mxu0 %v4304_v22 }
 0xccc   : > { %4001 = vmatpush3.bf16.msra.mxu0 %v4304_v22 }
 0xccd   : > { %4002 = vmatprep.subr.bf16.mxu0 %v4306_v1 }
 0xcd0   : > { %4003 = vmatpush3.bf16.msra.mxu0 %v4306_v1 }
 0xcd1   : > { %4004 = vmatprep.subr.bf16.mxu0 %v4308_v25 }
 0xcd4   : > { %4005 = vmatpush3.bf16.msra.mxu0 %v4308_v25 }
 0xcd5   : > { %4006 = vmatprep.subr.bf16.mxu0 %v4310_v30 }
 0xcd8   : > { %4007 = vmatpush3.bf16.msra.mxu0 %v4310_v30  ;;  %v4313_v30 = vld [vmem:[#allocation13 + $0x78] sm:$0xff]  }
 0xcd9   : > { %4008 = vmatprep.subr.bf16.mxu0 %v4312_v33  ;;  %4014 = vmatprep.subr.bf16.mxu1 %v4313_v30 }
 0xcdc   : > { %4009 = vmatpush3.bf16.msra.mxu0 %v4312_v33  ;;  %v4315_v33 = vld [vmem:[#allocation13 + $0x70] sm:$0xff]  }
 0xcdd   : > { %4034 = vmatprep.subr.bf16.mxu0 %v4314_v32 }
 0xd7f   : > { %v3972_v59 = vpop.f32.mrf.mxu0 }
 0xd80   : > { %v2180_v60 = vadd.f32 %v3972_v59, %v5291_v4  ;;  %v4507_v4 = vld [vmem:[%s5046_s21 + $0x18] sm:$0xff] }
 0xd81   : > { %v2163_v6 = vpop.f32.mrf.mxu0 }
 0xd82   : > { %v2184_v12 = vadd.f32 %v4505_v11, %v2180_v60  ;;  %v2178_v13 = vadd.f32 %v2163_v6, %v5295_v3 }
 0xd83   : > { %v3973_v14 = vpop.f32.mrf.mxu0 }
 0xd84   : > { %v5322_v15 = vadd.f32 %v3594_v2, %v2184_v12  ;;  %v2182_v7 = vadd.f32 %v4506_v16, %v2178_v13  ;;  %v2181_v8 = vadd.f32 %v3973_v14, %v5299_v17 }
 0xd85   : > { %v2166_v26 = vpop.f32.mrf.mxu0 }
 0xd86   : > { %v5326_v43 = vadd.f32 %v3594_v2, %v2182_v7  ;;  %v2185_v5 = vadd.f32 %v4507_v4, %v2181_v8  ;;  %v2179_v36 = vadd.f32 %v2166_v26, %v5301_v35  ;;  %2203 = vadd.xlane.f32.xlu0 %v5322_v15  ;;  %v2213_v35 = vmul.f32 %v5322_v15, %v5322_v15 }
 0xd88   : > { %v2183_v18 = vadd.f32 %v4508_v61, %v2179_v36  ;;  %2199 = vadd.xlane.f32.xlu1 %v5326_v43  ;;  %v2211_v3 = vmul.f32 %v5326_v43, %v5326_v43  ;;  %v5335_v27 = vadd.f32 %v3594_v2, %v2185_v5  ;;  %v3595_v5 = vld [vmem:[%s5491_s7] ss:$0 sm:$0xff] }
 0xd8a   : > { %v5337_v37 = vadd.f32 %v3594_v2, %v2183_v18  ;;  %2215 = vadd.xlane.f32.xlu0 %v2211_v3  ;;  %v2214_v62 = vmul.f32 %v5335_v27, %v5335_v27 }
 0xd8c   : > { %2205 = vadd.xlane.f32.xlu1 %v5335_v27  ;;  %v2212_v17 = vmul.f32 %v5337_v37, %v5337_v37 }
 0xd8e   : > { %2201 = vadd.xlane.f32.xlu0 %v5337_v37 }
 0xd90   : > { %2217 = vadd.xlane.f32.xlu1 %v2212_v17 }
 0xd92   : > { %2219 = vadd.xlane.f32.xlu0 %v2213_v35 }
 0xd94   : > { %2221 = vadd.xlane.f32.xlu1 %v2214_v62  ;;  %v3596_v62 = vld [vmem:[%s5492_s8] ss:$0 sm:$0xff] }
 0xe0f   : > { %v2204_v34 = vpop.xlane.xlu0 %2203 }
 0xe10   : > { %v2209_v46 = vmul.f32 0.0078125, %v2204_v34  ;;  %v4316_v34 = vld [vmem:[#allocation13 + $0x30] sm:$0xff]  }
 0xe11   : > { %v2200_v39 = vpop.xlane.xlu1 %2199 }
 0xe12   : > { %v2207_v40 = vmul.f32 0.0078125, %v2200_v39  ;;  %v2229_v55 = vmul.f32 %v2209_v46, %v2209_v46  ;;  %v2241_v18 = vsub.f32 %v5322_v15, %v2209_v46  ;;  %v4317_v39 = vld [vmem:[#allocation13 + $0x68] sm:$0xff]  }
 0xe13   : > { %v2216_v41 = vpop.xlane.xlu0 %2215  ;;  %v4325_v46 = vld [vmem:[#allocation13 + $0x48] sm:$0xff]  }
 0xe14   : > { %v2227_v10 = vmul.f32 %v2207_v40, %v2207_v40  ;;  %v2223_v63 = vmul.f32 0.0078125, %v2216_v41  ;;  %v2239_v26 = vsub.f32 %v5326_v43, %v2207_v40  ;;  %v4318_v40 = vld [vmem:[#allocation13 + $0x28] sm:$0xff]   ;;  %v4319_v41 = vld [vmem:[#allocation13 + $0x60] sm:$0xff]  }
 0xe15   : > { %v2206_v42 = vpop.xlane.xlu1 %2205 }
 0xe16   : > { %v2231_v44 = vsub.f32 %v2223_v63, %v2227_v10  ;;  %v2210_v51 = vmul.f32 0.0078125, %v2206_v42  ;;  %v4320_v10 = vld [vmem:[#allocation13 + $0x20] sm:$0xff]   ;;  %v4321_v63 = vld [vmem:[#allocation13 + $0x58] sm:$0xff]  }
 0xe17   : > { %v2202_v45 = vpop.xlane.xlu0 %2201  ;;  %v4322_v42 = vld [vmem:[#allocation13 + $0x18] sm:$0xff]  }
 0xe18   : > { %v2235_v47 = vmax.f32 %v2231_v44, 0.0  ;;  %v2208_v48 = vmul.f32 0.0078125, %v2202_v45  ;;  %v2230_v59 = vmul.f32 %v2210_v51, %v2210_v51  ;;  %v2242_v29 = vsub.f32 %v5335_v27, %v2210_v51  ;;  %v4323_v44 = vld [vmem:[#allocation13 + $0x50] sm:$0xff]   ;;  %v5371_v51 = vld [vmem:[%s5494_s10] sm:$0xf] }
 0xe19   : > { %v2218_v49 = vpop.xlane.xlu1 %2217  ;;  %v4324_v45 = vld [vmem:[#allocation13 + $0x10] sm:$0xff]  }
 0xe1a   : > { %v2243_v50 = vadd.f32 1e-05, %v2235_v47  ;;  %v2228_v52 = vmul.f32 %v2208_v48, %v2208_v48  ;;  %v2224_v53 = vmul.f32 0.0078125, %v2218_v49  ;;  %v2240_v36 = vsub.f32 %v5337_v37, %v2208_v48  ;;  %v4326_v47 = vld [vmem:[#allocation13 + $0x8] sm:$0xff]   ;;  %v4327_v48 = vld [vmem:[#allocation13 + $0x40] sm:$0xff]  }
 0xe1b   : > { %v2220_v54 = vpop.xlane.xlu0 %2219  ;;  %v4328_v49 = vld [vmem:[#allocation13] sm:$0xff]  }
 0xe1c   : > { %4433 = vrsqrt.f32 %v2243_v50  ;;  %v2232_v56 = vsub.f32 %v2224_v53, %v2228_v52  ;;  %v2225_v57 = vmul.f32 0.0078125, %v2220_v54  ;;  %v5365_v50 = vld [vmem:[#allocation11 + $0xe8] ss:$16 sps:$4 sm:$0xff]   ;;  %v2463_v52 = vrot.slane %v5371_v51, 1 }
 0xe1d   : > { %v2222_v58 = vpop.xlane.xlu1 %2221  ;;  %v2298_v53 = vrot.slane %v5371_v51, %v5103_v31 }
 0xe1e   : > { %v2236_v60 = vmax.f32 %v2232_v56, 0.0  ;;  %v2233_v2 = vsub.f32 %v2225_v57, %v2229_v55  ;;  %v2226_v6 = vmul.f32 0.0078125, %v2222_v58  ;;  %v2467_v54 = vrot.slane %v2463_v52, %v5103_v31 }
 0xe20   : > { %v2244_v11 = vadd.f32 1e-05, %v2236_v60  ;;  %v2237_v12 = vmax.f32 %v2233_v2, 0.0  ;;  %v2234_v13 = vsub.f32 %v2226_v6, %v2230_v59 }
 0xe22   : > { %4435 = vrsqrt.f32 %v2244_v11  ;;  %v2245_v14 = vadd.f32 1e-05, %v2237_v12  ;;  %v2238_v16 = vmax.f32 %v2234_v13, 0.0 }
 0xe24   : > { %4437 = vrsqrt.f32 %v2245_v14  ;;  %v2246_v7 = vadd.f32 1e-05, %v2238_v16 }
 0xe26   : > { %4439 = vrsqrt.f32 %v2246_v7 }
 0xe29   : > { %v4434_v8 = vpop.eup %4433 }
 0xe2a   : > { %v2251_v4 = vmul.f32 %v4434_v8, %v2239_v26 }
 0xe2c   : > { %v2261_v17 = vmul.f32 %v3595_v5, %v2251_v4 }
 0xe2e   : > { %v2271_v9 = vadd.f32 %v3596_v62, %v2261_v17 }
 0xe2f   : > { %v4436_v61 = vpop.eup %4435 }
 0xe30   : > { %v2252_v3 = vmul.f32 %v4436_v61, %v2240_v36 }
 0xe31   : > { %v4438_v35 = vpop.eup %4437 }
 0xe32   : > { %v2262_v38 = vmul.f32 %v3595_v5, %v2252_v3  ;;  %v2253_v19 = vmul.f32 %v4438_v35, %v2241_v18 }
 0xe33   : > { %v4440_v20 = vpop.eup %4439 }
 0xe34   : > { %v2272_v0 = vadd.f32 %v3596_v62, %v2262_v38  ;;  %v2254_v21 = vmul.f32 %v4440_v20, %v2242_v29  ;;  %v2263_v22 = vmul.f32 %v3595_v5, %v2253_v19 }
 0xe36   : > { %v5357_v23 = vpack.c.bf16 %v2272_v0, %v2271_v9  ;;  %v2264_v1 = vmul.f32 %v3595_v5, %v2254_v21  ;;  %v2273_v24 = vadd.f32 %v3596_v62, %v2263_v22 }
 0xe38   : > { %3990 = vmatprep.mubr.bf16.mxu1 %v5357_v23  ;;  %4010 = vmatprep.mubr.bf16.mxu0 %v5357_v23  ;;  %v2274_v25 = vadd.f32 %v3596_v62, %v2264_v1 }
 0xe3a   : > { %v5361_v28 = vpack.c.bf16 %v2274_v25, %v2273_v24 }
 0xe3c   : > { %3991 = vmatmul.mubr.bf16.vlgmr.msra.gmra.mxu1 %v5361_v28  ;;  %4011 = vmatmul.mubr.bf16.vlgmr.msra.gmra.mxu0 %v5361_v28 }
 0xe3d   : > { %4015 = vmatpush3.bf16.msra.mxu1 %v4313_v30  ;;  %4035 = vmatpush3.bf16.msra.mxu0 %v4314_v32 }
 0xe3e   : > { %4016 = vmatprep.subr.bf16.mxu1 %v4315_v33  ;;  %4036 = vmatprep.subr.bf16.mxu0 %v4316_v34 }
 0xe41   : > { %4017 = vmatpush3.bf16.msra.mxu1 %v4315_v33  ;;  %4037 = vmatpush3.bf16.msra.mxu0 %v4316_v34 }
 0xe42   : > { %4018 = vmatprep.subr.bf16.mxu1 %v4317_v39  ;;  %4038 = vmatprep.subr.bf16.mxu0 %v4318_v40 }
 0xe45   : > { %4019 = vmatpush3.bf16.msra.mxu1 %v4317_v39  ;;  %4039 = vmatpush3.bf16.msra.mxu0 %v4318_v40 }
 0xe46   : > { %4020 = vmatprep.subr.bf16.mxu1 %v4319_v41  ;;  %4040 = vmatprep.subr.bf16.mxu0 %v4320_v10 }
 0xe49   : > { %4021 = vmatpush3.bf16.msra.mxu1 %v4319_v41  ;;  %4041 = vmatpush3.bf16.msra.mxu0 %v4320_v10 }
 0xe4a   : > { %4022 = vmatprep.subr.bf16.mxu1 %v4321_v63  ;;  %4042 = vmatprep.subr.bf16.mxu0 %v4322_v42 }
 0xe4d   : > { %4023 = vmatpush3.bf16.msra.mxu1 %v4321_v63  ;;  %4043 = vmatpush3.bf16.msra.mxu0 %v4322_v42 }
 0xe4e   : > { %4024 = vmatprep.subr.bf16.mxu1 %v4323_v44  ;;  %4044 = vmatprep.subr.bf16.mxu0 %v4324_v45 }
 0xe51   : > { %4025 = vmatpush3.bf16.msra.mxu1 %v4323_v44  ;;  %4045 = vmatpush3.bf16.msra.mxu0 %v4324_v45 }
 0xe52   : > { %4026 = vmatprep.subr.bf16.mxu1 %v4325_v46  ;;  %4046 = vmatprep.subr.bf16.mxu0 %v4326_v47 }
 0xe55   : > { %4027 = vmatpush3.bf16.msra.mxu1 %v4325_v46  ;;  %4047 = vmatpush3.bf16.msra.mxu0 %v4326_v47 }
 0xe56   : > { %4028 = vmatprep.subr.bf16.mxu1 %v4327_v48  ;;  %4048 = vmatprep.subr.bf16.mxu0 %v4328_v49 }
 0xe59   : > { %4029 = vmatpush3.bf16.msra.mxu1 %v4327_v48  ;;  %4049 = vmatpush3.bf16.msra.mxu0 %v4328_v49 }
 0xe5a   : > { %4054 = vmatprep.subr.bf16.mxu1 %v5365_v50 }
 0xefc   : > { %v3992_v55 = vpop.f32.mrf.mxu1  ;;  %v4012_v56 = vpop.f32.mrf.mxu0 }
 0xefd   : > { %v5377_v57 = vadd.f32 %v3992_v55, %v2298_v53  ;;  %v5379_v58 = vadd.f32 %v4012_v56, %v2467_v54 }
 0xefe   : > { %v2382_v59 = vpop.f32.mrf.mxu1  ;;  %v2551_v60 = vpop.f32.mrf.mxu0 }
 0xeff   : > { %v3607_v2 = vmul.f32 -1.702, %v5377_v57  ;;  %v3619_v6 = vmul.f32 -1.702, %v5379_v58  ;;  %v5383_v11 = vadd.f32 %v2382_v59, %v2298_v53  ;;  %v5385_v12 = vadd.f32 %v2551_v60, %v2467_v54 }
 0xf00   : > { %v3993_v13 = vpop.f32.mrf.mxu1  ;;  %v4013_v14 = vpop.f32.mrf.mxu0 }
 0xf01   : > { %v2409_v16 = vmul.f32 1.442695, %v3607_v2  ;;  %v2578_v7 = vmul.f32 1.442695, %v3619_v6  ;;  %v3605_v8 = vmul.f32 -1.702, %v5383_v11  ;;  %v2394_v26 = vadd.f32 %v3993_v13, %v2298_v53 }
 0xf02   : > { %v3617_v4 = vmul.f32 -1.702, %v5385_v12  ;;  %v2563_v5 = vadd.f32 %v4013_v14, %v2467_v54  ;;  %v2385_v36 = vpop.f32.mrf.mxu1  ;;  %v2554_v61 = vpop.f32.mrf.mxu0 }
 0xf03   : > { %4441 = vpow2.f32 %v2409_v16  ;;  %v2405_v18 = vmul.f32 1.442695, %v3605_v8  ;;  %v3608_v3 = vmul.f32 -1.702, %v2394_v26  ;;  %v2386_v17 = vadd.f32 %v2385_v36, %v2298_v53 }
 0xf04   : > { %4443 = vpow2.f32 %v2578_v7  ;;  %v2574_v35 = vmul.f32 1.442695, %v3617_v4  ;;  %v3620_v62 = vmul.f32 -1.702, %v2563_v5  ;;  %v2555_v29 = vadd.f32 %v2554_v61, %v2467_v54  ;;  %v4330_v61 = vld [vmem:[#allocation11 + $0xc8] ss:$16 sps:$4 sm:$0xff]  }
 0xf05   : > { %4445 = vpow2.f32 %v2405_v18  ;;  %v2411_v38 = vmul.f32 1.442695, %v3608_v3  ;;  %v3606_v19 = vmul.f32 -1.702, %v2386_v17  ;;  %v4338_v18 = vld [vmem:[#allocation11 + $0xcc] ss:$16 sps:$4 sm:$0xff]  }
 0xf06   : > { %4447 = vpow2.f32 %v2574_v35  ;;  %v2580_v20 = vmul.f32 1.442695, %v3620_v62  ;;  %v3618_v9 = vmul.f32 -1.702, %v2555_v29  ;;  %v4339_v3 = vld [vmem:[#allocation11 + $0xac] ss:$16 sps:$4 sm:$0xff]  }
 0xf07   : > { %4449 = vpow2.f32 %v2411_v38  ;;  %v2407_v0 = vmul.f32 1.442695, %v3606_v19  ;;  %v4341_v35 = vld [vmem:[#allocation11 + $0x6c] ss:$16 sps:$4 sm:$0xff]   ;;  %v4346_v19 = vld [vmem:[#allocation13 + $0xb0] sm:$0xff]  }
 0xf08   : > { %4451 = vpow2.f32 %v2580_v20  ;;  %v2576_v21 = vmul.f32 1.442695, %v3618_v9  ;;  %v4342_v62 = vld [vmem:[#allocation11 + $0x4c] ss:$16 sps:$4 sm:$0xff]   ;;  %v4348_v9 = vld [vmem:[#allocation13 + $0xa0] sm:$0xff]  }
 0xf09   : > { %4453 = vpow2.f32 %v2407_v0  ;;  %v4344_v38 = vld [vmem:[#allocation11 + $0xc] ss:$16 sps:$4 sm:$0xff]  }
 0xf0a   : > { %4455 = vpow2.f32 %v2576_v21  ;;  %v4347_v20 = vld [vmem:[#allocation13 + $0xa8] sm:$0xff]   ;;  %v4349_v0 = vld [vmem:[#allocation13 + $0x98] sm:$0xff]   ;;  %v4350_v21 = vld [vmem:[#allocation13 + $0x90] sm:$0xff]  }
 0xf10   : > { %v4442_v22 = vpop.eup %4441 }
 0xf11   : > { %v4444_v1 = vpop.eup %4443  ;;  %v2415_v24 = vadd.f32 1.0, %v4442_v22  ;;  %v4351_v22 = vld [vmem:[#allocation13 + $0x88] sm:$0xff]  }
 0xf12   : > { %v4446_v25 = vpop.eup %4445  ;;  %v2584_v30 = vadd.f32 1.0, %v4444_v1  ;;  %v5398_v1 = vld [vmem:[#allocation13 + $0xf8] sm:$0xff]  }
 0xf13   : > { %v4448_v32 = vpop.eup %4447  ;;  %4457 = vrcp.f32 %v2415_v24  ;;  %v2413_v33 = vadd.f32 1.0, %v4446_v25 }
 0xf14   : > { %v4450_v34 = vpop.eup %4449  ;;  %4459 = vrcp.f32 %v2584_v30  ;;  %v2582_v39 = vadd.f32 1.0, %v4448_v32  ;;  %v2826_v30 = vrot.slane %v5371_v51, 2 }
 0xf15   : > { %v4452_v40 = vpop.eup %4451  ;;  %4461 = vrcp.f32 %v2413_v33  ;;  %v2416_v41 = vadd.f32 1.0, %v4450_v34 }
 0xf16   : > { %v4454_v10 = vpop.eup %4453  ;;  %4463 = vrcp.f32 %v2582_v39  ;;  %v2585_v63 = vadd.f32 1.0, %v4452_v40  ;;  %v2830_v33 = vrot.slane %v2826_v30, %v5103_v31  ;;  %v4355_v30 = vld [vmem:[#allocation13 + $0xe8] sm:$0xff]  }
 0xf17   : > { %v4456_v42 = vpop.eup %4455  ;;  %4465 = vrcp.f32 %v2416_v41  ;;  %v2414_v44 = vadd.f32 1.0, %v4454_v10 }
 0xf18   : > { %4467 = vrcp.f32 %v2585_v63  ;;  %v2583_v45 = vadd.f32 1.0, %v4456_v42 }
 0xf19   : > { %4469 = vrcp.f32 %v2414_v44 }
 0xf1a   : > { %4471 = vrcp.f32 %v2583_v45 }
 0xf20   : > { %v4458_v46 = vpop.eup %4457 }
 0xf21   : > { %v4460_v47 = vpop.eup %4459  ;;  %v2427_v6 = vmul.f32 %v4458_v46, %v5377_v57  ;;  %v4331_v57 = vld [vmem:[#allocation11 + $0xa8] ss:$16 sps:$4 sm:$0xff]  }
 0xf22   : > { %v4462_v48 = vpop.eup %4461  ;;  %v2596_v16 = vmul.f32 %v4460_v47, %v5379_v58  ;;  %v4333_v58 = vld [vmem:[#allocation11 + $0x68] ss:$16 sps:$4 sm:$0xff]  }
 0xf23   : > { %v4464_v49 = vpop.eup %4463  ;;  %v2425_v59 = vmul.f32 %v4462_v48, %v5383_v11  ;;  %v4332_v11 = vld [vmem:[#allocation11 + $0x88] ss:$16 sps:$4 sm:$0xff]  }
 0xf24   : > { %v4466_v52 = vpop.eup %4465  ;;  %v2594_v13 = vmul.f32 %v4464_v49, %v5385_v12  ;;  %v4334_v12 = vld [vmem:[#allocation11 + $0x48] ss:$16 sps:$4 sm:$0xff]  }
 0xf25   : > { %v4468_v53 = vpop.eup %4467  ;;  %v2428_v55 = vmul.f32 %v4466_v52, %v2394_v26  ;;  %v4335_v26 = vld [vmem:[#allocation11 + $0x28] ss:$16 sps:$4 sm:$0xff]  }
 0xf26   : > { %v4470_v54 = vpop.eup %4469  ;;  %v2597_v60 = vmul.f32 %v4468_v53, %v2563_v5  ;;  %v4336_v5 = vld [vmem:[#allocation11 + $0x8] ss:$16 sps:$4 sm:$0xff]  }
 0xf27   : > { %v4472_v56 = vpop.eup %4471  ;;  %v2426_v2 = vmul.f32 %v4470_v54, %v2386_v17  ;;  %v2430_v8 = vpack.c.bf16 %v2428_v55, %v2427_v6  ;;  %v4340_v17 = vld [vmem:[#allocation11 + $0x8c] ss:$16 sps:$4 sm:$0xff]  }
 0xf28   : > { %v2595_v14 = vmul.f32 %v4472_v56, %v2555_v29  ;;  %v2599_v36 = vpack.c.bf16 %v2597_v60, %v2596_v16  ;;  %v4343_v29 = vld [vmem:[#allocation11 + $0x2c] ss:$16 sps:$4 sm:$0xff]  }
 0xf29   : > { %v2429_v7 = vpack.c.bf16 %v2426_v2, %v2425_v59 }
 0xf2a   : > { %v2598_v4 = vpack.c.bf16 %v2595_v14, %v2594_v13  ;;  %v3096_v14 = vrot.slane %v5371_v51, 3 }
 0xf2b   : > { %4050 = vmatprep.mubr.bf16.mxu0 %v2429_v7 }
 0xf2c   : > { %4030 = vmatprep.mubr.bf16.mxu1 %v2598_v4  ;;  %4051 = vmatmul.mubr.bf16.vlgmr.msra.gmra.mxu0 %v2430_v8  ;;  %v3100_v8 = vrot.slane %v3096_v14, %v5103_v31 }
 0xf2d   : > { %4031 = vmatmul.mubr.bf16.vlgmr.msra.gmra.mxu1 %v2599_v36 }
 0xf2e   : > { %4055 = vmatpush3.bf16.msra.mxu1 %v5365_v50  ;;  %4070 = vmatprep.mubr.bf16.mxu1 %v5357_v23  ;;  %v4337_v50 = vld [vmem:[#allocation11 + $0xec] ss:$16 sps:$4 sm:$0xff]  }
 0xf2f   : > { %4056 = vmatprep.subr.bf16.mxu1 %v4330_v61 }
 0xf32   : > { %4057 = vmatpush3.bf16.msra.mxu1 %v4330_v61 }
 0xf33   : > { %4058 = vmatprep.subr.bf16.mxu1 %v4331_v57 }
 0xf36   : > { %4059 = vmatpush3.bf16.msra.mxu1 %v4331_v57 }
 0xf37   : > { %4060 = vmatprep.subr.bf16.mxu1 %v4332_v11 }
 0xf3a   : > { %4061 = vmatpush3.bf16.msra.mxu1 %v4332_v11 }
 0xf3b   : > { %4062 = vmatprep.subr.bf16.mxu1 %v4333_v58 }
 0xf3e   : > { %4063 = vmatpush3.bf16.msra.mxu1 %v4333_v58 }
 0xf3f   : > { %4064 = vmatprep.subr.bf16.mxu1 %v4334_v12 }
 0xf42   : > { %4065 = vmatpush3.bf16.msra.mxu1 %v4334_v12 }
 0xf43   : > { %4066 = vmatprep.subr.bf16.mxu1 %v4335_v26 }
 0xf46   : > { %4067 = vmatpush3.bf16.msra.mxu1 %v4335_v26 }
 0xf47   : > { %4068 = vmatprep.subr.bf16.mxu1 %v4336_v5 }
 0xf4a   : > { %4069 = vmatpush3.bf16.msra.mxu1 %v4336_v5 }
 0xf4b   : > { %4094 = vmatprep.subr.bf16.mxu1 %v4337_v50 }
 0xf4d   : > { %4071 = vmatmul.mubr.bf16.vlgmr.msra.gmra.mxu1 %v5361_v28 }
 0xf4e   : > { %4095 = vmatpush3.bf16.msra.mxu1 %v4337_v50  ;;  %4110 = vmatprep.mubr.bf16.mxu1 %v5357_v23  ;;  %v4345_v23 = vld [vmem:[#allocation13 + $0xb8] sm:$0xff]  }
 0xf4f   : > { %4096 = vmatprep.subr.bf16.mxu1 %v4338_v18  ;;  %4074 = vmatprep.subr.bf16.mxu0 %v4345_v23 }
 0xf50   : > { %4075 = vmatpush3.bf16.msra.mxu0 %v4345_v23 }
 0xf51   : > { %4076 = vmatprep.subr.bf16.mxu0 %v4346_v19 }
 0xf52   : > { %4097 = vmatpush3.bf16.msra.mxu1 %v4338_v18 }
 0xf53   : > { %4098 = vmatprep.subr.bf16.mxu1 %v4339_v3 }
 0xf54   : > { %4077 = vmatpush3.bf16.msra.mxu0 %v4346_v19 }
 0xf55   : > { %4078 = vmatprep.subr.bf16.mxu0 %v4347_v20 }
 0xf56   : > { %4099 = vmatpush3.bf16.msra.mxu1 %v4339_v3 }
 0xf57   : > { %4100 = vmatprep.subr.bf16.mxu1 %v4340_v17 }
 0xf58   : > { %4079 = vmatpush3.bf16.msra.mxu0 %v4347_v20 }
 0xf59   : > { %4080 = vmatprep.subr.bf16.mxu0 %v4348_v9 }
 0xf5a   : > { %4101 = vmatpush3.bf16.msra.mxu1 %v4340_v17 }
 0xf5b   : > { %4102 = vmatprep.subr.bf16.mxu1 %v4341_v35 }
 0xf5c   : > { %4081 = vmatpush3.bf16.msra.mxu0 %v4348_v9 }
 0xf5d   : > { %4082 = vmatprep.subr.bf16.mxu0 %v4349_v0 }
 0xf5e   : > { %4103 = vmatpush3.bf16.msra.mxu1 %v4341_v35 }
 0xf5f   : > { %4104 = vmatprep.subr.bf16.mxu1 %v4342_v62 }
 0xf60   : > { %4083 = vmatpush3.bf16.msra.mxu0 %v4349_v0 }
 0xf61   : > { %4084 = vmatprep.subr.bf16.mxu0 %v4350_v21 }
 0xf62   : > { %4105 = vmatpush3.bf16.msra.mxu1 %v4342_v62 }
 0xf63   : > { %4106 = vmatprep.subr.bf16.mxu1 %v4343_v29 }
 0xf64   : > { %4085 = vmatpush3.bf16.msra.mxu0 %v4350_v21 }
 0xf65   : > { %4086 = vmatprep.subr.bf16.mxu0 %v4351_v22 }
 0xf66   : > { %4107 = vmatpush3.bf16.msra.mxu1 %v4343_v29 }
 0xf67   : > { %4108 = vmatprep.subr.bf16.mxu1 %v4344_v38 }
 0xf68   : > { %4087 = vmatpush3.bf16.msra.mxu0 %v4351_v22 }
 0xf6a   : > { %4109 = vmatpush3.bf16.msra.mxu1 %v4344_v38 }
 0xf6d   : > { %4111 = vmatmul.mubr.bf16.vlgmr.msra.gmra.mxu1 %v5361_v28  ;;  %v4352_v28 = vld [vmem:[#allocation13 + $0x80] sm:$0xff]  }
 0xf6e   : > { %4088 = vmatprep.subr.bf16.mxu0 %v4352_v28 }
 0xf6f   : > { %4089 = vmatpush3.bf16.msra.mxu0 %v4352_v28  ;;  %v4354_v28 = vld [vmem:[#allocation13 + $0xf0] sm:$0xff]  }
 0xf70   : > { %4114 = vmatprep.subr.bf16.mxu0 %v5398_v1 }
 0xfed   : > { %v5401_v24 = vpop.f32.mrf.mxu1 }
 0xfef   : > { %v5403_v25 = vpop.f32.mrf.mxu1 }
 0xff1   : > { %v5406_v32 = vpop.f32.mrf.mxu1 }
 0xff3   : > { %v5409_v34 = vpop.f32.mrf.mxu1 }
0x100d   : > { %v4072_v39 = vpop.f32.mrf.mxu1 }
0x100e   : > { %v2923_v40 = vadd.f32 %v4072_v39, %v2830_v33 }
0x100f   : > { %v2914_v41 = vpop.f32.mrf.mxu1 }
0x1010   : > { %v3647_v10 = vmul.f32 -1.702, %v2923_v40  ;;  %v2915_v63 = vadd.f32 %v2914_v41, %v2830_v33  ;;  %v4356_v41 = vld [vmem:[#allocation13 + $0xe0] sm:$0xff]  }
0x1011   : > { %v4073_v42 = vpop.f32.mrf.mxu1 }
0x1012   : > { %v2941_v44 = vmul.f32 1.442695, %v3647_v10  ;;  %v3645_v45 = vmul.f32 -1.702, %v2915_v63  ;;  %v2926_v46 = vadd.f32 %v4073_v42, %v2830_v33 }
0x1013   : > { %v2917_v47 = vpop.f32.mrf.mxu1 }
0x1014   : > { %v2937_v48 = vmul.f32 1.442695, %v3645_v45  ;;  %v3648_v49 = vmul.f32 -1.702, %v2926_v46  ;;  %v2918_v52 = vadd.f32 %v2917_v47, %v2830_v33  ;;  %4473 = vpow2.f32 %v2941_v44  ;;  %v4357_v44 = vld [vmem:[#allocation13 + $0xd8] sm:$0xff]   ;;  %v4359_v47 = vld [vmem:[#allocation13 + $0xc8] sm:$0xff]  }
0x1016   : > { %4475 = vpow2.f32 %v2937_v48  ;;  %v2943_v53 = vmul.f32 1.442695, %v3648_v49  ;;  %v3646_v54 = vmul.f32 -1.702, %v2918_v52  ;;  %v4360_v48 = vld [vmem:[#allocation13 + $0xc0] sm:$0xff]  }
0x1018   : > { %4477 = vpow2.f32 %v2943_v53  ;;  %v2939_v55 = vmul.f32 1.442695, %v3646_v54 }
0x101a   : > { %4479 = vpow2.f32 %v2939_v55 }
0x1021   : > { %v4474_v56 = vpop.eup %4473 }
0x1022   : > { %v2947_v6 = vadd.f32 1.0, %v4474_v56 }
0x1023   : > { %v4476_v59 = vpop.eup %4475 }
0x1024   : > { %v2945_v60 = vadd.f32 1.0, %v4476_v59 }
0x1025   : > { %v4478_v2 = vpop.eup %4477 }
0x1026   : > { %v2948_v13 = vadd.f32 1.0, %v4478_v2  ;;  %4481 = vrcp.f32 %v2945_v60 }
0x1027   : > { %v4480_v16 = vpop.eup %4479 }
0x1028   : > { %4483 = vrcp.f32 %v2948_v13  ;;  %v2946_v7 = vadd.f32 1.0, %v4480_v16  ;;  %v4052_v13 = vpop.f32.mrf.mxu0 }
0x1029   : > { %4485 = vrcp.f32 %v2947_v6 }
0x102a   : > { %4487 = vrcp.f32 %v2946_v7  ;;  %v2795_v14 = vpop.f32.mrf.mxu0 }
0x102c   : > { %v4053_v16 = vpop.f32.mrf.mxu0 }
0x102d   : > { %v4112_v4 = vpop.f32.mrf.mxu1 }
0x102e   : > { %v5413_v36 = vadd.f32 %v4112_v4, %v3100_v8  ;;  %v2798_v7 = vpop.f32.mrf.mxu0 }
0x102f   : > { %v3184_v61 = vpop.f32.mrf.mxu1 }
0x1030   : > { %v3667_v57 = vmul.f32 -1.702, %v5413_v36  ;;  %v5416_v11 = vadd.f32 %v3184_v61, %v3100_v8 }
0x1031   : > { %v4113_v58 = vpop.f32.mrf.mxu1 }
0x1032   : > { %v3211_v12 = vmul.f32 1.442695, %v3667_v57  ;;  %v3665_v51 = vmul.f32 -1.702, %v5416_v11  ;;  %v3196_v26 = vadd.f32 %v4113_v58, %v3100_v8  ;;  %v2804_v57 = vadd.f32 %v4052_v13, %v5401_v24 }
0x1033   : > { %v3187_v5 = vpop.f32.mrf.mxu1  ;;  %v4482_v50 = vpop.eup %4481 }
0x1034   : > { %v3207_v18 = vmul.f32 1.442695, %v3665_v51  ;;  %v3668_v3 = vmul.f32 -1.702, %v3196_v26  ;;  %4489 = vpow2.f32 %v3211_v12  ;;  %v3188_v31 = vadd.f32 %v3187_v5, %v3100_v8 }
0x1035   : > { %v4484_v17 = vpop.eup %4483  ;;  %v2957_v19 = vmul.f32 %v4482_v50, %v2915_v63  ;;  %v2807_v51 = vadd.f32 %v4053_v16, %v5406_v32  ;;  %v3677_v50 = vld [vmem:[%s5496_s12] ss:$0 sm:$0xff] }
0x1036   : > { %v4486_v35 = vpop.eup %4485  ;;  %4491 = vpow2.f32 %v3207_v18  ;;  %v3213_v62 = vmul.f32 1.442695, %v3668_v3  ;;  %v2960_v38 = vmul.f32 %v4484_v17, %v2926_v46  ;;  %v3666_v23 = vmul.f32 -1.702, %v3188_v31 }
0x1037   : > { %v4488_v29 = vpop.eup %4487  ;;  %v2959_v9 = vmul.f32 %v4486_v35, %v2923_v40  ;;  %v2799_v3 = vadd.f32 %v2798_v7, %v5409_v34 }
0x1038   : > { %v2958_v20 = vmul.f32 %v4488_v29, %v2918_v52  ;;  %4493 = vpow2.f32 %v3213_v62  ;;  %v3209_v0 = vmul.f32 1.442695, %v3666_v23 }
0x1039   : > { %v2962_v22 = vpack.c.bf16 %v2960_v38, %v2959_v9 }
0x103a   : > { %v2961_v21 = vpack.c.bf16 %v2958_v20, %v2957_v19  ;;  %4495 = vpow2.f32 %v3209_v0 }
0x103c   : > { %4090 = vmatprep.mubr.bf16.mxu0 %v2961_v21 }
0x103d   : > { %4091 = vmatmul.mubr.bf16.vlgmr.msra.gmra.mxu0 %v2962_v22 }
0x103e   : > { %4115 = vmatpush3.bf16.msra.mxu0 %v5398_v1  ;;  %v4358_v1 = vld [vmem:[#allocation13 + $0xd0] sm:$0xff]  }
0x103f   : > { %4116 = vmatprep.subr.bf16.mxu0 %v4354_v28 }
0x1041   : > { %v4490_v33 = vpop.eup %4489 }
0x1042   : > { %4117 = vmatpush3.bf16.msra.mxu0 %v4354_v28  ;;  %v3217_v42 = vadd.f32 1.0, %v4490_v33 }
0x1043   : > { %v4492_v39 = vpop.eup %4491  ;;  %4118 = vmatprep.subr.bf16.mxu0 %v4355_v30 }
0x1044   : > { %v3215_v63 = vadd.f32 1.0, %v4492_v39 }
0x1045   : > { %v4494_v10 = vpop.eup %4493 }
0x1046   : > { %v3218_v40 = vadd.f32 1.0, %v4494_v10  ;;  %4119 = vmatpush3.bf16.msra.mxu0 %v4355_v30 }
0x1047   : > { %4120 = vmatprep.subr.bf16.mxu0 %v4356_v41  ;;  %v4496_v45 = vpop.eup %4495 }
0x1048   : > { %4497 = vrcp.f32 %v3218_v40  ;;  %v3216_v46 = vadd.f32 1.0, %v4496_v45 }
0x1049   : > { %4499 = vrcp.f32 %v3215_v63 }
0x104a   : > { %4501 = vrcp.f32 %v3217_v42  ;;  %4121 = vmatpush3.bf16.msra.mxu0 %v4356_v41 }
0x104b   : > { %4503 = vrcp.f32 %v3216_v46  ;;  %4122 = vmatprep.subr.bf16.mxu0 %v4357_v44 }
0x104e   : > { %4123 = vmatpush3.bf16.msra.mxu0 %v4357_v44 }
0x104f   : > { %4124 = vmatprep.subr.bf16.mxu0 %v4358_v1 }
0x1052   : > { %4125 = vmatpush3.bf16.msra.mxu0 %v4358_v1 }
0x1053   : > { %4126 = vmatprep.subr.bf16.mxu0 %v4359_v47 }
0x1055   : > { %v4498_v49 = vpop.eup %4497 }
0x1056   : > { %v4500_v52 = vpop.eup %4499  ;;  %4127 = vmatpush3.bf16.msra.mxu0 %v4359_v47  ;;  %v3230_v55 = vmul.f32 %v4498_v49, %v3196_v26 }
0x1057   : > { %v4502_v53 = vpop.eup %4501  ;;  %4128 = vmatprep.subr.bf16.mxu0 %v4360_v48  ;;  %v3227_v56 = vmul.f32 %v4500_v52, %v5416_v11  ;;  %v2796_v11 = vadd.f32 %v2795_v14, %v5403_v25 }
0x1058   : > { %v4504_v54 = vpop.eup %4503  ;;  %v3229_v60 = vmul.f32 %v4502_v53, %v5413_v36 }
0x1059   : > { %v3228_v59 = vmul.f32 %v4504_v54, %v3188_v31 }
0x105a   : > { %4129 = vmatpush3.bf16.msra.mxu0 %v4360_v48  ;;  %v3232_v6 = vpack.c.bf16 %v3230_v55, %v3229_v60 }
0x105b   : > { %v3231_v2 = vpack.c.bf16 %v3228_v59, %v3227_v56 }
0x105d   : > { %4130 = vmatprep.mubr.bf16.mxu0 %v3231_v2 }
0x105e   : > { %4131 = vmatmul.mubr.bf16.vlgmr.msra.gmra.mxu0 %v3232_v6 }
0x10fd   : > { %v4092_v8 = vpop.f32.mrf.mxu0 }
0x10fe   : > { %v3078_v12 = vadd.f32 %v4092_v8, %v2804_v57 }
0x10ff   : > { %v3061_v4 = vpop.f32.mrf.mxu0 }
0x1100   : > { %v3076_v26 = vadd.f32 %v3061_v4, %v2796_v11 }
0x1101   : > { %v4093_v61 = vpop.f32.mrf.mxu0 }
0x1102   : > { %v3079_v17 = vadd.f32 %v4093_v61, %v2807_v51 }
0x1103   : > { %v3064_v58 = vpop.f32.mrf.mxu0 }
0x1104   : > { %v3077_v35 = vadd.f32 %v3064_v58, %v2799_v3 }
0x111e   : > { %v4132_v36 = vpop.f32.mrf.mxu0 }
0x111f   : > { %v3348_v5 = vadd.f32 %v4132_v36, %v3078_v12 }
0x1120   : > { %v3331_v18 = vpop.f32.mrf.mxu0 }
0x1121   : > { %v3352_v24 = vadd.f32 %v3348_v5, %v5322_v15  ;;  %v3346_v31 = vadd.f32 %v3331_v18, %v3076_v26 }
0x1122   : > { %v4133_v25 = vpop.f32.mrf.mxu0 }
0x1123   : > { %v3363_v62 = vadd.f32 %v3677_v50, %v3352_v24  ;;  %v3350_v29 = vadd.f32 %v3346_v31, %v5326_v43  ;;  %v3349_v32 = vadd.f32 %v4133_v25, %v3079_v17 }
0x1124   : > { %v3334_v38 = vpop.f32.mrf.mxu0 }
0x1125   : > { %3367 = vst [vmem:[%s542_s9 + $0x10] sm:$0xff] %v3363_v62  ;;  %v3361_v23 = vadd.f32 %v3677_v50, %v3350_v29  ;;  %v3353_v34 = vadd.f32 %v3349_v32, %v5335_v27  ;;  %v3347_v19 = vadd.f32 %v3334_v38, %v3077_v35 }
0x1127   : > { %3365 = vst [vmem:[%s542_s9] sm:$0xff] %v3361_v23  ;;  %v3364_v15 = vadd.f32 %v3677_v50, %v3353_v34  ;;  %v3351_v43 = vadd.f32 %v3347_v19, %v5337_v37 }
0x1129   : > { %3368 = vst [vmem:[%s542_s9 + $0x18] sm:$0xff] %v3364_v15  ;;  %v3362_v20 = vadd.f32 %v3677_v50, %v3351_v43 }
0x112b   : > { %3366 = vst [vmem:[%s542_s9 + $0x8] sm:$0xff] %v3362_v20 }
0x112c   : > { %4706 = shalt.err (!%p4703_p6)
}
0x112d   : > { %s4707_s23 = scalar_lea.hbm %s5441_s17, 512  ;;  %s4711_s5 = scalar_lea.hbm %s5497_s13, 1024 }
0x112e   : > { %p4708_p4 = scmp.ne.s32.totalorder %s5441_s17, %s4707_s23  ;;  %p4712_p9 = scmp.lt.s32.totalorder %s5441_s17, %s5497_s13 }
0x112f   : > { %p4713_p11 = scmp.lt.s32.totalorder %s4711_s5, %s4707_s23 }
0x1130   : > { %p4709_p1 = pnand %p4708_p4, %p5532_p13 }
0x1131   : > { %p4714_p10 = por %p4713_p11, %p4712_p9 }
0x1132   : > { %p4710_p3 = pneg %p4709_p1 }
0x1134   : > { %p4715_p12 = pnand %p4714_p10, %p4710_p3 }
0x1136   : > { %4718 = shalt.err (!%p4715_p12)
}
0x1137   : > { %s4793_s30 = smov 128   ;;  %s4794_s29 = smov 8  }
0x1138   : > { %4160 = dma.vmem_to_hbm [thread:$0]  (%p5532_p13), %s5435_s15, 512, %s5441_s17, %s3370_s16, %s4793_s30, %s4793_s30, %s4794_s29  }
0x1139 PF: > { %s3399_s1 = sand.u32 1, %s4757_s25   ;;  %p5533_p0 = scmp.ne.s32.totalorder %s5522_s22, 0 }
0x113a   : > { %p5534_p2 = scmp.ge.s32.totalorder %s4769_s28, 2  ;;  %s3400_s14 = scalar_lea.sflag [#allocation4], %s3399_s1 }
0x113c   : > { %p4186_p5 = pnand %p5534_p2, %p5533_p0 }
0x113e   : > { %p4187_p8 = pneg %p4186_p5 }
0x1140   : > { %4752 = dma.done.wait (%p4187_p8), %s3400_s14, 512  }
0x1141   : > { %4754 = vsyncadd (%p4187_p8), %s3400_s14, 4294966784  ;;  %s5535_s11 = sld [smem:[#allocation20_spill]]  ;;  %p29_p7 = scmp.ge.s32.totalorder %s4968_s18, 4  }
0x1142   : > { %s5536_s25 = smov %s4761_s26  ;;  %s5537_s26 = smov %s4765_s27 }
0x1143   : > { %s5539_s28 = smov %s4968_s18  ;;  %31 = sbr.rel (!%p29_p7) target bundleno = 15 (0xf), region = 141 }
0x1147   : > { %s5538_s27 = smov %s5535_s11 }
0x1148   :  { %3405 = vsyncpa [#allocation3], 1 }
0x1149   :  { %3407 = vsyncpa [#allocation3 + $0x1], 1 }
0x114a   :  { %3408 = vsyncpa [#allocation6], 1 }
0x114b   :  { %3409 = vsyncpa [#allocation9], 1 }
0x114c   :  { %3410 = vsyncpa [#allocation12], 1 }
0x114d   :  { %3411 = vsyncpa [#allocation4], 1 }
0x114e   :  { %3413 = vsyncpa [#allocation4 + $0x1], 1 }

</bundles_post_ra>
